<compile_context>
chip_gen: v7x
topology: tpu7x:2x2x1
jax: 0.10.0
libtpu: 0.0.40
codegen_flags: <defaults>
</compile_context>

<pallas_src>
import functools

import jax
import jax.numpy as jnp
from jax.experimental import pallas as pl
from jax.experimental.pallas import tpu as pltpu


_VMEM_LIMIT_BYTES = 48 * 1024 * 1024      # safe on v5e/v6e (128 MiB) and v7x (64 MiB)
_IO_TILE_BUDGET_BYTES = 40 * 1024 * 1024  # double-buffered x/out tiles + 1 f32 temp


def _round_up(n, m):
    return ((n + m - 1) // m) * m


def _sigmoid(z):
    # One EUP transcendental per vreg; numerically identical to 1/(1+exp(-z))
    # to ~1 ulp and saturates cleanly for large |z|.
    return 0.5 * jnp.tanh(0.5 * z) + 0.5


def sae_kernel(x_ref,
               w1_ref, b1_ref,
               w2_ref, b2_ref,
               w3_ref, b3_ref,
               w4_ref, b4_ref,
               o_ref):
    """Full 4-layer MLP forward for one batch tile, entirely in VMEM."""
    x = x_ref[...]
    if x.dtype != jnp.float32:      # static (trace-time) branch; bf16-I/O path
        x = x.astype(jnp.float32)

    h = _sigmoid(jnp.dot(x, w1_ref[...],
                         preferred_element_type=jnp.float32) + b1_ref[...])
    h = _sigmoid(jnp.dot(h, w2_ref[...],
                         preferred_element_type=jnp.float32) + b2_ref[...])
    h = _sigmoid(jnp.dot(h, w3_ref[...],
                         preferred_element_type=jnp.float32) + b3_ref[...])
    # Final layer fused straight into the (lane-dense, unmasked) store.
    o_ref[...] = (jnp.dot(h, w4_ref[...], preferred_element_type=jnp.float32)
                  + b4_ref[...]).astype(o_ref.dtype)


def _choose_tb(B, nb_movies, f_pad, x_itemsize, o_itemsize):
    """Batch-tile rows from a VMEM byte budget (v7x-safe), >= 2 grid steps."""
    per_row = (2 * nb_movies * x_itemsize    # double-buffered x tile
               + 2 * f_pad * o_itemsize      # double-buffered out tile
               + f_pad * 4)                  # one f32 temp for the fused fc4
    tb = _IO_TILE_BUDGET_BYTES // per_row
    tb = min(tb, 1024)
    if B >= 16:
        # Keep at least 2 grid steps so v7x's 2 TensorCores both get work.
        tb = min(tb, _round_up(pl.cdiv(B, 2), 8))
    else:
        tb = min(tb, _round_up(B, 8))
    return max(8, (tb // 8) * 8)


def prepare_params(params, nb_movies):
    """One-time prep: lane-pad fc4's weight/bias (output side only).

    Call once outside the hot loop and reuse; padded columns are zero so the
    kept [:, :nb_movies] slice of the output is unchanged.
    """
    f_pad = _round_up(nb_movies, 128)
    w4, b4 = params["w4"], params["b4"]
    assert w4.shape == (20, nb_movies) and b4.shape == (1, nb_movies)
    p = dict(params)
    p["w4"] = jnp.zeros((w4.shape[0], f_pad), w4.dtype).at[:, :nb_movies].set(w4)
    p["b4"] = jnp.zeros((1, f_pad), b4.dtype).at[:, :nb_movies].set(b4)
    return p


@functools.partial(jax.jit, static_argnames=("tb",))
def sae_forward_padded(x, params, tb=None):
    """Hot path. x: [B, nb_movies]; params from prepare_params (w4/b4 padded).

    Returns the LANE-PADDED output [B, round_up(nb_movies, 128)] so no extra
    HBM pass is spent padding x or slicing the result.  Columns >= nb_movies
    are exactly zero.
    """
    B, nb_movies = x.shape
    w1, b1 = params["w1"], params["b1"]
    w2, b2 = params["w2"], params["b2"]
    w3, b3 = params["w3"], params["b3"]
    w4, b4 = params["w4"], params["b4"]
    f_pad = w4.shape[1]
    assert f_pad % 128 == 0 and f_pad >= nb_movies, "call prepare_params first"

    out_dtype = x.dtype
    if tb is None:
        tb = _choose_tb(B, nb_movies, f_pad,
                        jnp.dtype(x.dtype).itemsize,
                        jnp.dtype(out_dtype).itemsize)

    def resident(a):
        # Full (small) array with a constant index_map: DMA'd once, stays in
        # VMEM across the whole batch grid.
        return pl.BlockSpec(a.shape, lambda i: (0, 0))

    grid = (pl.cdiv(B, tb),)  # ragged last block: OOB rows masked on store

    return pl.pallas_call(
        sae_kernel,
        out_shape=jax.ShapeDtypeStruct((B, f_pad), out_dtype),
        grid_spec=pltpu.PrefetchScalarGridSpec(
            num_scalar_prefetch=0,
            grid=grid,
            in_specs=[
                # x tile: features UNPADDED (last dim == full array dim is
                # legal); masked input loads are cheap, unlike masked stores.
                pl.BlockSpec((tb, nb_movies), lambda i: (i, 0)),
                resident(w1), resident(b1),
                resident(w2), resident(b2),
                resident(w3), resident(b3),
                resident(w4), resident(b4),
            ],
            out_specs=pl.BlockSpec((tb, f_pad), lambda i: (i, 0)),
        ),
        compiler_params=pltpu.CompilerParams(
            dimension_semantics=("parallel",),
            vmem_limit_bytes=_VMEM_LIMIT_BYTES,
        ),
    )(x, w1, b1, w2, b2, w3, b3, w4, b4)


def sae_forward(x, params, tb=None):
    """Convenience wrapper returning the exact [B, nb_movies] output.

    NOTE: the trailing slice is an extra HBM pass; hot loops should call
    prepare_params once and use sae_forward_padded directly.
    """
    nb_movies = x.shape[1]
    out_p = sae_forward_padded(x, prepare_params(params, nb_movies), tb=tb)
    return out_p[:, :nb_movies]


def init_params(key, nb_movies):
    """PyTorch-style init: U(-1/sqrt(fan_in), 1/sqrt(fan_in)).

    Weights stored as [in, out] (transposed vs torch's [out, in]); biases as
    [1, out] so they stay 2-D for TPU layout.
    """
    dims = [(nb_movies, 20), (20, 10), (10, 20), (20, nb_movies)]
    params = {}
    keys = jax.random.split(key, 2 * len(dims))
    for idx, (fan_in, fan_out) in enumerate(dims):
        bound = 1.0 / jnp.sqrt(float(fan_in))
        w = jax.random.uniform(keys[2 * idx], (fan_in, fan_out),
                               dtype=jnp.float32, minval=-bound, maxval=bound)
        b = jax.random.uniform(keys[2 * idx + 1], (1, fan_out),
                               dtype=jnp.float32, minval=-bound, maxval=bound)
        params[f"w{idx + 1}"] = w
        params[f"b{idx + 1}"] = b
    return params


def sae_reference(x, params):
    """Pure-JAX reference of the same forward pass."""
    h = jax.nn.sigmoid(x @ params["w1"] + params["b1"])
    h = jax.nn.sigmoid(h @ params["w2"] + params["b2"])
    h = jax.nn.sigmoid(h @ params["w3"] + params["b3"])
    return h @ params["w4"] + params["b4"]


if __name__ == "__main__":
    # nb_movies is data-dependent in the original script; pick a small value
    # that is NOT 128-aligned (200 -> output lane-padded to 256) and a batch
    # that is NOT a multiple of the derived tile (300 -> tb=152, 2 grid steps,
    # ragged masked last block) to exercise both paths.
    NB_MOVIES = 200
    BATCH = 300

    key = jax.random.PRNGKey(0)
    k_x, k_p = jax.random.split(key)

    # Ratings-like input in [0, 5].
    x = jax.random.uniform(k_x, (BATCH, NB_MOVIES), dtype=jnp.float32,
                           minval=0.0, maxval=5.0)
    params = init_params(k_p, NB_MOVIES)

    # Hot path: pad fc4 params once, keep the lane-padded output.
    prepared = prepare_params(params, NB_MOVIES)
    out_padded = sae_forward_padded(x, prepared)
    out_padded = jax.block_until_ready(out_padded)
    assert out_padded.shape == (BATCH, _round_up(NB_MOVIES, 128))

    # Exact-shape view for validation only (consumers can keep padded layout).
    out = out_padded[:, :NB_MOVIES]
    ref = sae_reference(x, params)
    assert out.shape == (BATCH, NB_MOVIES)
    assert jnp.allclose(out, ref, atol=1e-5, rtol=1e-5), "mismatch vs reference"

    print("KERNEL_OK")
</pallas_src>

<mosaic_0001>
module attributes {stable_mosaic.version = 11 : i64} {
  func.func @sae_kernel(%arg0: i32, %arg1: memref<152x200xf32, #tpu.memory_space<vmem>>, %arg2: memref<200x20xf32, #tpu.memory_space<vmem>>, %arg3: memref<1x20xf32, #tpu.memory_space<vmem>>, %arg4: memref<20x10xf32, #tpu.memory_space<vmem>>, %arg5: memref<1x10xf32, #tpu.memory_space<vmem>>, %arg6: memref<10x20xf32, #tpu.memory_space<vmem>>, %arg7: memref<1x20xf32, #tpu.memory_space<vmem>>, %arg8: memref<20x256xf32, #tpu.memory_space<vmem>>, %arg9: memref<1x256xf32, #tpu.memory_space<vmem>>, %arg10: memref<152x256xf32, #tpu.memory_space<vmem>>) attributes {dimension_semantics = [#tpu.dimension_semantics<parallel>], iteration_bounds = array<i64: 2>, scalar_prefetch = 0 : i64, scratch_operands = 0 : i64, tpu.core_type = #tpu.core_type<tc>, window_params = [{transform_indices = @transform_0, window_bounds = array<i64: 152, 200>}, {pipeline_mode = #tpu.pipeline_mode<synchronous>, transform_indices = @transform_1, window_bounds = array<i64: 200, 20>}, {pipeline_mode = #tpu.pipeline_mode<synchronous>, transform_indices = @transform_2, window_bounds = array<i64: 1, 20>}, {pipeline_mode = #tpu.pipeline_mode<synchronous>, transform_indices = @transform_3, window_bounds = array<i64: 20, 10>}, {pipeline_mode = #tpu.pipeline_mode<synchronous>, transform_indices = @transform_4, window_bounds = array<i64: 1, 10>}, {pipeline_mode = #tpu.pipeline_mode<synchronous>, transform_indices = @transform_5, window_bounds = array<i64: 10, 20>}, {pipeline_mode = #tpu.pipeline_mode<synchronous>, transform_indices = @transform_6, window_bounds = array<i64: 1, 20>}, {pipeline_mode = #tpu.pipeline_mode<synchronous>, transform_indices = @transform_7, window_bounds = array<i64: 20, 256>}, {pipeline_mode = #tpu.pipeline_mode<synchronous>, transform_indices = @transform_8, window_bounds = array<i64: 1, 256>}, {transform_indices = @transform_9, window_bounds = array<i64: 152, 256>}]} {
    %c0 = arith.constant 0 : index
    %c0_0 = arith.constant 0 : index
    %0 = vector.load %arg1[%c0, %c0_0] : memref<152x200xf32, #tpu.memory_space<vmem>>, vector<152x200xf32>
    %c0_1 = arith.constant 0 : index
    %c0_2 = arith.constant 0 : index
    %1 = vector.load %arg2[%c0_1, %c0_2] : memref<200x20xf32, #tpu.memory_space<vmem>>, vector<200x20xf32>
    %cst = arith.constant dense<0.000000e+00> : vector<152x20xf32>
    %2 = tpu.matmul %0, %1, %cst {dimension_numbers = #tpu.dot_dimension_numbers<[1], [0], [0], [1], [0, 0, 1, 1], [], []>} : vector<152x200xf32>, vector<200x20xf32>, vector<152x20xf32> -> vector<152x20xf32>
    %c0_3 = arith.constant 0 : index
    %c0_4 = arith.constant 0 : index
    %3 = vector.load %arg3[%c0_3, %c0_4] : memref<1x20xf32, #tpu.memory_space<vmem>>, vector<1x20xf32>
    %4 = vector.broadcast %3 : vector<1x20xf32> to vector<152x20xf32>
    %5 = arith.addf %2, %4 : vector<152x20xf32>
    %cst_5 = arith.constant 5.000000e-01 : f32
    %6 = vector.broadcast %cst_5 : f32 to vector<152x20xf32>
    %7 = arith.mulf %6, %5 : vector<152x20xf32>
    %8 = math.tanh %7 : vector<152x20xf32>
    %cst_6 = arith.constant 5.000000e-01 : f32
    %9 = vector.broadcast %cst_6 : f32 to vector<152x20xf32>
    %10 = arith.mulf %9, %8 : vector<152x20xf32>
    %cst_7 = arith.constant 5.000000e-01 : f32
    %11 = vector.broadcast %cst_7 : f32 to vector<152x20xf32>
    %12 = arith.addf %10, %11 : vector<152x20xf32>
    %c0_8 = arith.constant 0 : index
    %c0_9 = arith.constant 0 : index
    %13 = vector.load %arg4[%c0_8, %c0_9] : memref<20x10xf32, #tpu.memory_space<vmem>>, vector<20x10xf32>
    %cst_10 = arith.constant dense<0.000000e+00> : vector<152x10xf32>
    %14 = tpu.matmul %12, %13, %cst_10 {dimension_numbers = #tpu.dot_dimension_numbers<[1], [0], [0], [1], [0, 0, 1, 1], [], []>} : vector<152x20xf32>, vector<20x10xf32>, vector<152x10xf32> -> vector<152x10xf32>
    %c0_11 = arith.constant 0 : index
    %c0_12 = arith.constant 0 : index
    %15 = vector.load %arg5[%c0_11, %c0_12] : memref<1x10xf32, #tpu.memory_space<vmem>>, vector<1x10xf32>
    %16 = vector.broadcast %15 : vector<1x10xf32> to vector<152x10xf32>
    %17 = arith.addf %14, %16 : vector<152x10xf32>
    %cst_13 = arith.constant 5.000000e-01 : f32
    %18 = vector.broadcast %cst_13 : f32 to vector<152x10xf32>
    %19 = arith.mulf %18, %17 : vector<152x10xf32>
    %20 = math.tanh %19 : vector<152x10xf32>
    %cst_14 = arith.constant 5.000000e-01 : f32
    %21 = vector.broadcast %cst_14 : f32 to vector<152x10xf32>
    %22 = arith.mulf %21, %20 : vector<152x10xf32>
    %cst_15 = arith.constant 5.000000e-01 : f32
    %23 = vector.broadcast %cst_15 : f32 to vector<152x10xf32>
    %24 = arith.addf %22, %23 : vector<152x10xf32>
    %c0_16 = arith.constant 0 : index
    %c0_17 = arith.constant 0 : index
    %25 = vector.load %arg6[%c0_16, %c0_17] : memref<10x20xf32, #tpu.memory_space<vmem>>, vector<10x20xf32>
    %cst_18 = arith.constant dense<0.000000e+00> : vector<152x20xf32>
    %26 = tpu.matmul %24, %25, %cst_18 {dimension_numbers = #tpu.dot_dimension_numbers<[1], [0], [0], [1], [0, 0, 1, 1], [], []>} : vector<152x10xf32>, vector<10x20xf32>, vector<152x20xf32> -> vector<152x20xf32>
    %c0_19 = arith.constant 0 : index
    %c0_20 = arith.constant 0 : index
    %27 = vector.load %arg7[%c0_19, %c0_20] : memref<1x20xf32, #tpu.memory_space<vmem>>, vector<1x20xf32>
    %28 = vector.broadcast %27 : vector<1x20xf32> to vector<152x20xf32>
    %29 = arith.addf %26, %28 : vector<152x20xf32>
    %cst_21 = arith.constant 5.000000e-01 : f32
    %30 = vector.broadcast %cst_21 : f32 to vector<152x20xf32>
    %31 = arith.mulf %30, %29 : vector<152x20xf32>
    %32 = math.tanh %31 : vector<152x20xf32>
    %cst_22 = arith.constant 5.000000e-01 : f32
    %33 = vector.broadcast %cst_22 : f32 to vector<152x20xf32>
    %34 = arith.mulf %33, %32 : vector<152x20xf32>
    %cst_23 = arith.constant 5.000000e-01 : f32
    %35 = vector.broadcast %cst_23 : f32 to vector<152x20xf32>
    %36 = arith.addf %34, %35 : vector<152x20xf32>
    %c0_24 = arith.constant 0 : index
    %c0_25 = arith.constant 0 : index
    %37 = vector.load %arg8[%c0_24, %c0_25] : memref<20x256xf32, #tpu.memory_space<vmem>>, vector<20x256xf32>
    %cst_26 = arith.constant dense<0.000000e+00> : vector<152x256xf32>
    %38 = tpu.matmul %36, %37, %cst_26 {dimension_numbers = #tpu.dot_dimension_numbers<[1], [0], [0], [1], [0, 0, 1, 1], [], []>} : vector<152x20xf32>, vector<20x256xf32>, vector<152x256xf32> -> vector<152x256xf32>
    %c0_27 = arith.constant 0 : index
    %c0_28 = arith.constant 0 : index
    %39 = vector.load %arg9[%c0_27, %c0_28] : memref<1x256xf32, #tpu.memory_space<vmem>>, vector<1x256xf32>
    %40 = vector.broadcast %39 : vector<1x256xf32> to vector<152x256xf32>
    %41 = arith.addf %38, %40 : vector<152x256xf32>
    %c0_29 = arith.constant 0 : index
    %c0_30 = arith.constant 0 : index
    %42 = vector.load %arg10[%c0_29, %c0_30] : memref<152x256xf32, #tpu.memory_space<vmem>>, vector<152x256xf32>
    tpu.vector_store %arg10[%c0_29, %c0_30], %41 {strides = array<i32>} : memref<152x256xf32, #tpu.memory_space<vmem>>, vector<152x256xf32>,
    return
  }
  func.func @transform_0(%arg0: i32) -> (i32, i32) {
    %c0_i32 = arith.constant 0 : i32
    %c0_i32_0 = arith.constant 0 : i32
    return %arg0, %c0_i32 : i32, i32
  }
  func.func @transform_1(%arg0: i32) -> (i32, i32) {
    %c0_i32 = arith.constant 0 : i32
    %c0_i32_0 = arith.constant 0 : i32
    %c0_i32_1 = arith.constant 0 : i32
    return %c0_i32, %c0_i32_0 : i32, i32
  }
  func.func @transform_2(%arg0: i32) -> (i32, i32) {
    %c0_i32 = arith.constant 0 : i32
    %c0_i32_0 = arith.constant 0 : i32
    %c0_i32_1 = arith.constant 0 : i32
    return %c0_i32, %c0_i32_0 : i32, i32
  }
  func.func @transform_3(%arg0: i32) -> (i32, i32) {
    %c0_i32 = arith.constant 0 : i32
    %c0_i32_0 = arith.constant 0 : i32
    %c0_i32_1 = arith.constant 0 : i32
    return %c0_i32, %c0_i32_0 : i32, i32
  }
  func.func @transform_4(%arg0: i32) -> (i32, i32) {
    %c0_i32 = arith.constant 0 : i32
    %c0_i32_0 = arith.constant 0 : i32
    %c0_i32_1 = arith.constant 0 : i32
    return %c0_i32, %c0_i32_0 : i32, i32
  }
  func.func @transform_5(%arg0: i32) -> (i32, i32) {
    %c0_i32 = arith.constant 0 : i32
    %c0_i32_0 = arith.constant 0 : i32
    %c0_i32_1 = arith.constant 0 : i32
    return %c0_i32, %c0_i32_0 : i32, i32
  }
  func.func @transform_6(%arg0: i32) -> (i32, i32) {
    %c0_i32 = arith.constant 0 : i32
    %c0_i32_0 = arith.constant 0 : i32
    %c0_i32_1 = arith.constant 0 : i32
    return %c0_i32, %c0_i32_0 : i32, i32
  }
  func.func @transform_7(%arg0: i32) -> (i32, i32) {
    %c0_i32 = arith.constant 0 : i32
    %c0_i32_0 = arith.constant 0 : i32
    %c0_i32_1 = arith.constant 0 : i32
    return %c0_i32, %c0_i32_0 : i32, i32
  }
  func.func @transform_8(%arg0: i32) -> (i32, i32) {
    %c0_i32 = arith.constant 0 : i32
    %c0_i32_0 = arith.constant 0 : i32
    %c0_i32_1 = arith.constant 0 : i32
    return %c0_i32, %c0_i32_0 : i32, i32
  }
  func.func @transform_9(%arg0: i32) -> (i32, i32) {
    %c0_i32 = arith.constant 0 : i32
    %c0_i32_0 = arith.constant 0 : i32
    return %arg0, %c0_i32 : i32, i32
  }
}

</mosaic_0001>

<bundles_post_ra>
// kernel: sae_forward_padded.1
= control target key start
LH: loop header
LB: loop body
LE: loop exit
PB: predicated region body
PF: predicated region fallthrough
CT: control target
= control target key end

     0   :  { %14 = vsyncpa [#allocation3], 0  ;;  %s2891_s0 = inlined_call_operand.vmem [shape: f32[300,200], index: 0, kind: input, shape index: {}]   ;;  %s2892_s1 = inlined_call_operand.vmem [shape: f32[200,20], index: 1, kind: input, shape index: {}]   ;;  %s2893_s2 = inlined_call_operand.vmem [shape: f32[1,20], index: 2, kind: input, shape index: {}]   ;;  %s2894_s3 = inlined_call_operand.vmem [shape: f32[20,10], index: 3, kind: input, shape index: {}]   ;;  %s2895_s4 = inlined_call_operand.vmem [shape: f32[1,10], index: 4, kind: input, shape index: {}]   ;;  %s2896_s5 = inlined_call_operand.vmem [shape: f32[10,20], index: 5, kind: input, shape index: {}]   ;;  %s2897_s6 = inlined_call_operand.vmem [shape: f32[1,20], index: 6, kind: input, shape index: {}]   ;;  %s2898_s7 = inlined_call_operand.vmem [shape: f32[20,256], index: 7, kind: input, shape index: {}]   ;;  %s2899_s8 = inlined_call_operand.vmem [shape: f32[1,256], index: 8, kind: input, shape index: {}]   ;;  %s2900_s9 = inlined_call_operand.hbm [shape: f32[300,256], index: 9, kind: output, shape index: {}]  }
   0x1   :  { %16 = vsyncpa [#allocation3 + $0x1], 0  ;;  %s2287_s30 = smov 0   ;;  %s2289_s10 = smov 0  }
   0x2   :  { %s2291_s11 = smov 0   ;;  %s2293_s12 = smov 0  }
   0x3 LB: > { %s2308_s13 = sadd.s32 4294967295, %s2228_s12   ;;  %s1691_s14 = sadd.s32 4294967294, %s2228_s12   ;;  %s2228_s12 = sphi %s2293_s12, %s2906_s12   ;;  %s2224_s11 = sphi %s2291_s11, %s2905_s11   ;;  %s2220_s10 = sphi %s2289_s10, %s2904_s10   ;;  %s2216_s30 = sphi %s2287_s30, %s2903_s30  }
   0x4   : > { %s2312_s15 = sadd.s32 1, %s2228_s12   ;;  %s223_s16 = sadd.s32 1, %s2224_s11 }
   0x5   : > { %s220_s17 = ssub.s32 %s2228_s12, %s2312_s15  ;;  %p233_p0 = scmp.ne.s32.totalorder %s2224_s11, %s2220_s10 }
   0x6   : > { %p221_p1 = scmp.eq.s32.totalorder %s220_s17, 0  ;;  %p234_p2 = scmp.eq.s32.totalorder %s2308_s13, 1 }
   0x7   : > { %p239_p3 = scmp.ne.s32.totalorder %s2220_s10, %s2216_s30  ;;  %p240_p4 = scmp.eq.s32.totalorder %s1691_s14, 1 }
   0x8   : > { %s2323_s18 = scalar_select %p221_p1, %s2224_s11, %s223_s16  }
   0x9   : > { %p2325_p5 = por %p234_p2, %p233_p0  ;;  %p2329_p6 = por %p240_p4, %p239_p3 }
   0xa   : > { %p1694_p7 = scmp.ge.s32.totalorder %s2228_s12, 1  ;;  %p292_p8 = scmp.lt.s32.totalorder %s2228_s12, 3 }
   0xc   : > { %p293_p9 = pnand %p1694_p7, %p292_p8 }
   0xd   : > { %v375_v0 = vld [vmem:[%s2892_s1] sm:$0xff] (!%p293_p9)  ;;  %v376_v1 = vld [vmem:[%s2892_s1 + $0x8] sm:$0xff] (!%p293_p9)  ;;  %v377_v2 = vld [vmem:[%s2892_s1 + $0x10] sm:$0xff] (!%p293_p9)  ;;  %s329_s27 = smul.u32 (!%p293_p9), 19, %s2308_s13  ;;  %v2230_v3 = vmov (!%p293_p9), 0.0|0.0   ;;  %vm407_vm0 = vcmask (!%p293_p9), 588800  }
   0xe   : > { %296 = sbr.rel (%p293_p9) target bundleno = 1060 (0x424), region = 56  ;;  %1955 = vmatprep.subr.bf16.mxu0 (!%p293_p9), %v2230_v3  ;;  %v1956_v4 = vpack.c.bf16 (!%p293_p9), %v376_v1, %v375_v0  ;;  %v378_v5 = vld [vmem:[%s2892_s1 + $0x18] sm:$0xff] (!%p293_p9)  ;;  %1991 = vmatprep.subr.bf16.mxu1 (!%p293_p9), %v2230_v3  ;;  %v379_v7 = vld [vmem:[%s2892_s1 + $0x20] sm:$0xff] (!%p293_p9)  ;;  %v380_v8 = vld [vmem:[%s2892_s1 + $0x28] sm:$0xff] (!%p293_p9)  ;;  %v2231_v38 = vmov (!%p293_p9), 0.0   ;;  %vm769_vm1 = vcmask (!%p293_p9), 1043456  }
   0xf   : > { %p330_p10 = scmp.lt.s32.totalorder (!%p293_p9), %s329_s27, 37  ;;  %v1959_v6 = vpack.c.bf16 (!%p293_p9), %v378_v5, %v377_v2  ;;  %v1962_v9 = vpack.c.bf16 (!%p293_p9), %v380_v8, %v379_v7  ;;  %v381_v10 = vld [vmem:[%s2892_s1 + $0x30] sm:$0xff] (!%p293_p9)  ;;  %v382_v11 = vld [vmem:[%s2892_s1 + $0x38] sm:$0xff] (!%p293_p9)  ;;  %v383_v14 = vld [vmem:[%s2892_s1 + $0x40] sm:$0xff] (!%p293_p9)  ;;  %vm2232_vm2 = vmmov (!%p293_p9), 0   ;;  %vm1076_vm3 = vcmask (!%p293_p9), 1041408  }
  0x10   : > { %1957 = vmatpush1.bf16.msra.mxu0 (!%p293_p9), %v1956_v4  ;;  %v1965_v13 = vpack.c.bf16 (!%p293_p9), %v382_v11, %v381_v10  ;;  %v384_v15 = vld [vmem:[%s2892_s1 + $0x48] sm:$0xff] (!%p293_p9)  ;;  %v385_v17 = vld [vmem:[%s2892_s1 + $0x50] sm:$0xff] (!%p293_p9)  ;;  %v386_v18 = vld [vmem:[%s2892_s1 + $0x58] sm:$0xff] (!%p293_p9)  ;;  %1837 = vmatprep.mubr.msk.f32.mxu1 (!%p293_p9), %vm2232_vm2, %v2231_v38  ;;  %vm711_vm4 = vcmask (!%p293_p9), 162816   ;;  %vm2233_vm5 = vmmov (!%p293_p9), 1   ;;  %vm1018_vm7 = vcmask (!%p293_p9), 80896  }
  0x11   : > { %1958 = vmatprep.subr.bf16.mxu0 (!%p293_p9), %v2230_v3  ;;  %v1968_v16 = vpack.c.bf16 (!%p293_p9), %v384_v15, %v383_v14  ;;  %v1971_v19 = vpack.c.bf16 (!%p293_p9), %v386_v18, %v385_v17  ;;  %v387_v20 = vld [vmem:[%s2892_s1 + $0x60] sm:$0xff] (!%p293_p9)  ;;  %v388_v21 = vld [vmem:[%s2892_s1 + $0x68] sm:$0xff] (!%p293_p9)  ;;  %v389_v23 = vld [vmem:[%s2892_s1 + $0x70] sm:$0xff] (!%p293_p9)  ;;  %s326_s23 = sand.u32 (!%p293_p9), 1, %s2220_s10   ;;  %s1787_s29 = smul.u32 (!%p293_p9), 4864, %s2308_s13 }
  0x12   : > { %v1974_v22 = vpack.c.bf16 (!%p293_p9), %v388_v21, %v387_v20  ;;  %v390_v24 = vld [vmem:[%s2892_s1 + $0x78] sm:$0xff] (!%p293_p9)  ;;  %v391_v26 = vld [vmem:[%s2892_s1 + $0x80] sm:$0xff] (!%p293_p9)  ;;  %v392_v27 = vld [vmem:[%s2892_s1 + $0x88] sm:$0xff] (!%p293_p9)  ;;  %s2006_s26 = smul.u32 (!%p293_p9), 304, %s326_s23  ;;  %s2850_s13 = scalar_lea.sflag (!%p293_p9), [#allocation3], %s326_s23 }
  0x13   : > { %v1977_v25 = vpack.c.bf16 (!%p293_p9), %v390_v24, %v389_v23  ;;  %v1980_v28 = vpack.c.bf16 (!%p293_p9), %v392_v27, %v391_v26  ;;  %v393_v29 = vld [vmem:[%s2892_s1 + $0x90] sm:$0xff] (!%p293_p9)  ;;  %v394_v30 = vld [vmem:[%s2892_s1 + $0x98] sm:$0xff] (!%p293_p9)  ;;  %v395_v32 = vld [vmem:[%s2892_s1 + $0xa0] sm:$0xff] (!%p293_p9)  ;;  %s2841_s17 = scalar_lea.hbm (!%p293_p9), %s2900_s9, %s1787_s29 }
  0x14   : > { %1960 = vmatpush1.bf16.msra.mxu0 (!%p293_p9), %v1959_v6  ;;  %v1983_v31 = vpack.c.bf16 (!%p293_p9), %v394_v30, %v393_v29  ;;  %v396_v33 = vld [vmem:[%s2892_s1 + $0xa8] sm:$0xff] (!%p293_p9)  ;;  %v397_v35 = vld [vmem:[%s2892_s1 + $0xb0] sm:$0xff] (!%p293_p9)  ;;  %v398_v36 = vld [vmem:[%s2892_s1 + $0xb8] sm:$0xff] (!%p293_p9)  ;;  %s2763_s28 = scalar_lea.vmem (!%p293_p9), [#allocation2], %s2006_s26 }
  0x15   : > { %s2908_s27 = smov (!%p330_p10, %s329_s27), 37  ;;  %1961 = vmatprep.subr.bf16.mxu0 %v2230_v3  ;;  %v1986_v34 = vpack.c.bf16 %v396_v33, %v395_v32  ;;  %v1989_v37 = vpack.c.bf16 %v398_v36, %v397_v35  ;;  %v399_v39 = vld [vmem:[%s2892_s1 + $0xc0] sm:$0xff]  ;;  %v702_v15 = vld [vmem:[%s2894_s3 + $0x8] sm:$0xff]  ;;  %v703_v17 = vld [vmem:[%s2894_s3 + $0x10] sm:$0xf]  ;;  %s1629_s14 = sshll.u32 %s2763_s28, 4  ;;  %s2843_s14 = int_to_ptr.vmem [resolvable:$true] %s1629_s14 }
  0x16   : > { %s1784_s22 = sshll.u32 %s2908_s27, 4  ;;  %v701_v14 = vld [vmem:[%s2894_s3] sm:$0xff]  ;;  %vm1996_vm6 = vmpackc.low %vm1076_vm3, %vm2233_vm5  ;;  %s2166_s21 = scalar_lea.vmem %s2843_s14, 4864 }
  0x17   : > { %s2360_s25 = scalar_lea.vmem %s2891_s0, %s1784_s22  ;;  %v2505_v18 = vld [vmem:[%s2893_s2] ss:$0 sm:$0xff]  ;;  %p2167_p11 = scmp.ne.s32.totalorder %s2843_s14, %s2166_s21 }
  0x18   : > { %v338_v12 = vld [vmem:[%s2360_s25 + $0x8] sm:$0xff]  ;;  %1963 = vmatpush1.bf16.msra.mxu0 %v1962_v9  ;;  %v337_v40 = vld [vmem:[%s2360_s25] sm:$0xff]  ;;  %v340_v41 = vld [vmem:[%s2360_s25 + $0x18] sm:$0xff]  ;;  %s2234_s22 = smov [#allocation2]  }
  0x19   : > { %1698 = vmatprep.mubr.msk.f32.mxu0 %vm407_vm0, %v338_v12  ;;  %1964 = vmatprep.subr.bf16.mxu0 %v2230_v3  ;;  %v339_v42 = vld [vmem:[%s2360_s25 + $0x10] sm:$0xff]  ;;  %v342_v43 = vld [vmem:[%s2360_s25 + $0x28] sm:$0xff]  ;;  %v341_v44 = vld [vmem:[%s2360_s25 + $0x20] sm:$0xff]  ;;  %p2168_p12 = pnand %p2167_p11, %p2325_p5  ;;  %s2170_s24 = sshll.u32 %s2234_s22, 4  ;;  %s2171_s24 = int_to_ptr.vmem [resolvable:$false] %s2170_s24 }
  0x1a   : > { %v344_v45 = vld [vmem:[%s2360_s25 + $0x38] sm:$0xff]  ;;  %v343_v46 = vld [vmem:[%s2360_s25 + $0x30] sm:$0xff]  ;;  %v346_v47 = vld [vmem:[%s2360_s25 + $0x48] sm:$0xff]  ;;  %p2173_p0 = scmp.lt.s32.totalorder %s2843_s14, %s2171_s24 }
  0x1b   : > { %v345_v48 = vld [vmem:[%s2360_s25 + $0x40] sm:$0xff]  ;;  %v348_v49 = vld [vmem:[%s2360_s25 + $0x58] sm:$0xff]  ;;  %v347_v50 = vld [vmem:[%s2360_s25 + $0x50] sm:$0xff]  ;;  %p2169_p13 = pneg %p2168_p12 }
  0x1c   : > { %1966 = vmatpush1.bf16.msra.mxu0 %v1965_v13  ;;  %v350_v51 = vld [vmem:[%s2360_s25 + $0x68] sm:$0xff]  ;;  %v349_v52 = vld [vmem:[%s2360_s25 + $0x60] sm:$0xff]  ;;  %v352_v53 = vld [vmem:[%s2360_s25 + $0x78] sm:$0xff] }
  0x1d   : > { %1967 = vmatprep.subr.bf16.mxu0 %v2230_v3  ;;  %v351_v54 = vld [vmem:[%s2360_s25 + $0x70] sm:$0xff]  ;;  %v354_v55 = vld [vmem:[%s2360_s25 + $0x88] sm:$0xff]  ;;  %v353_v56 = vld [vmem:[%s2360_s25 + $0x80] sm:$0xff] }
  0x1e   : > { %v356_v57 = vld [vmem:[%s2360_s25 + $0x98] sm:$0xff]  ;;  %v355_v58 = vld [vmem:[%s2360_s25 + $0x90] sm:$0xff]  ;;  %v358_v59 = vld [vmem:[%s2360_s25 + $0xa8] sm:$0xff] }
  0x1f   : > { %v357_v60 = vld [vmem:[%s2360_s25 + $0xa0] sm:$0xff]  ;;  %v360_v61 = vld [vmem:[%s2360_s25 + $0xb8] sm:$0xff]  ;;  %v359_v62 = vld [vmem:[%s2360_s25 + $0xb0] sm:$0xff] }
  0x20   : > { %1969 = vmatpush1.bf16.msra.mxu0 %v1968_v16  ;;  %v362_v63 = vld [vmem:[%s2360_s25 + $0xc8] sm:$0xff]  ;;  %v361_v0 = vld [vmem:[%s2360_s25 + $0xc0] sm:$0xff]  ;;  %v364_v1 = vld [vmem:[%s2360_s25 + $0xd8] sm:$0xff]  ;;  %v1992_v16 = vpack.c.bf16 %v702_v15, %v701_v14 }
  0x21   : > { %1970 = vmatprep.subr.bf16.mxu0 %v2230_v3  ;;  %v363_v2 = vld [vmem:[%s2360_s25 + $0xd0] sm:$0xff]  ;;  %v366_v4 = vld [vmem:[%s2360_s25 + $0xe8] sm:$0xff]  ;;  %v365_v5 = vld [vmem:[%s2360_s25 + $0xe0] sm:$0xff] }
  0x22   : > { %v368_v6 = vld [vmem:[%s2360_s25 + $0xf8] sm:$0xff]  ;;  %v367_v7 = vld [vmem:[%s2360_s25 + $0xf0] sm:$0xff]  ;;  %v370_v8 = vld [vmem:[%s2360_s25 + $0x108] sm:$0xff]  ;;  %1993 = vmatpush3.bf16.msra.mxu1 %v1992_v16 }
  0x23   : > { %v369_v9 = vld [vmem:[%s2360_s25 + $0x100] sm:$0xff]  ;;  %v372_v10 = vld [vmem:[%s2360_s25 + $0x118] sm:$0xff]  ;;  %v371_v11 = vld [vmem:[%s2360_s25 + $0x110] sm:$0xff]  ;;  %1835 = vmatprep.subr.mxu1 %v2231_v38 }
  0x24   : > { %1972 = vmatpush1.bf16.msra.mxu0 %v1971_v19  ;;  %v374_v12 = vld [vmem:[%s2360_s25 + $0x128] sm:$0xff]  ;;  %v373_v13 = vld [vmem:[%s2360_s25 + $0x120] sm:$0xff]  ;;  %s2172_s25 = scalar_lea.vmem %s2171_s24, 9728 }
  0x25   : > { %1973 = vmatprep.subr.bf16.mxu0 %v2230_v3  ;;  %v1009_v33 = vld [vmem:[%s2896_s5] sm:$0xff]  ;;  %p2174_p1 = scmp.lt.s32.totalorder %s2172_s25, %s2166_s21 }
  0x26   : > { %1836 = vmatpush3.msk.msra.mxu1 %vm769_vm1, %v703_v17 }
  0x27   : > { %1994 = vmatprep.subr.bf16.mxu1 %v2230_v3  ;;  %p2175_p2 = por %p2174_p1, %p2173_p0 }
  0x28   : > { %1975 = vmatpush1.bf16.msra.mxu0 %v1974_v22 }
  0x29   : > { %1976 = vmatprep.subr.bf16.mxu0 %v2230_v3  ;;  %p2176_p3 = pnand %p2175_p2, %p2169_p13 }
  0x2c   : > { %1978 = vmatpush1.bf16.msra.mxu0 %v1977_v25 }
  0x2d   : > { %1979 = vmatprep.subr.bf16.mxu0 %v2230_v3 }
  0x30   : > { %1981 = vmatpush1.bf16.msra.mxu0 %v1980_v28 }
  0x31   : > { %1982 = vmatprep.subr.bf16.mxu0 %v2230_v3 }
  0x34   : > { %1984 = vmatpush1.bf16.msra.mxu0 %v1983_v31 }
  0x35   : > { %1985 = vmatprep.subr.bf16.mxu0 %v2230_v3 }
  0x38   : > { %1987 = vmatpush1.bf16.msra.mxu0 %v1986_v34  ;;  %v1010_v34 = vld [vmem:[%s2896_s5 + $0x8] sm:$0x3] }
  0x39   : > { %1988 = vmatprep.subr.bf16.mxu0 %v2230_v3 }
  0x3c   : > { %1990 = vmatpush1.bf16.msra.mxu0 %v1989_v37 }
  0x3d   : > { %513 = vmatprep.subr.mxu0 %v2231_v38 }
  0x40   : > { %514 = vmatpush1.msra.mxu0 %v399_v39 }
  0x41   : > { %530 = vmatmul.mubr.f32.vlgmr.msra.gmra.mrb[0].mxu0 %v337_v40 }
  0x42   : > { %1699 = vmatprep.mubr.msk.f32.mxu0 %vm407_vm0, %v340_v41 }
  0x45   : > { %535 = vmatmul.mubr.f32.gmra.mrb[2].mxu0 %v339_v42  ;;  %v1995_v42 = vpack.c.bf16 %v1010_v34, %v1009_v33 }
  0x46   : > { %1700 = vmatprep.mubr.msk.f32.mxu0 %vm407_vm0, %v342_v43 }
  0x49   : > { %540 = vmatmul.mubr.f32.gmra.mrb[4].mxu0 %v341_v44 }
  0x4a   : > { %1701 = vmatprep.mubr.msk.f32.mxu0 %vm407_vm0, %v344_v45 }
  0x4d   : > { %545 = vmatmul.mubr.f32.gmra.mrb[6].mxu0 %v343_v46 }
  0x4e   : > { %1702 = vmatprep.mubr.msk.f32.mxu0 %vm407_vm0, %v346_v47 }
  0x51   : > { %550 = vmatmul.mubr.f32.gmra.mrb[8].mxu0 %v345_v48 }
  0x52   : > { %1703 = vmatprep.mubr.msk.f32.mxu0 %vm407_vm0, %v348_v49 }
  0x55   : > { %555 = vmatmul.mubr.f32.gmra.mrb[10].mxu0 %v347_v50 }
  0x56   : > { %1704 = vmatprep.mubr.msk.f32.mxu0 %vm407_vm0, %v350_v51 }
  0x59   : > { %560 = vmatmul.mubr.f32.gmra.mrb[12].mxu0 %v349_v52 }
  0x5a   : > { %1705 = vmatprep.mubr.msk.f32.mxu0 %vm407_vm0, %v352_v53 }
  0x5d   : > { %565 = vmatmul.mubr.f32.gmra.mrb[14].mxu0 %v351_v54 }
  0x5e   : > { %1706 = vmatprep.mubr.msk.f32.mxu0 %vm407_vm0, %v354_v55 }
  0x61   : > { %570 = vmatmul.mubr.f32.gmra.mrb[16].mxu0 %v353_v56 }
  0x62   : > { %1707 = vmatprep.mubr.msk.f32.mxu0 %vm407_vm0, %v356_v57 }
  0x65   : > { %575 = vmatmul.mubr.f32.gmra.mrb[18].mxu0 %v355_v58 }
  0x66   : > { %1708 = vmatprep.mubr.msk.f32.mxu0 %vm407_vm0, %v358_v59 }
  0x69   : > { %580 = vmatmul.mubr.f32.gmra.mrb[20].mxu0 %v357_v60 }
  0x6a   : > { %1709 = vmatprep.mubr.msk.f32.mxu0 %vm407_vm0, %v360_v61 }
  0x6d   : > { %585 = vmatmul.mubr.f32.gmra.mrb[22].mxu0 %v359_v62 }
  0x6e   : > { %1710 = vmatprep.mubr.msk.f32.mxu0 %vm407_vm0, %v362_v63 }
  0x71   : > { %590 = vmatmul.mubr.f32.gmra.mrb[24].mxu0 %v361_v0 }
  0x72   : > { %1711 = vmatprep.mubr.msk.f32.mxu0 %vm407_vm0, %v364_v1 }
  0x75   : > { %595 = vmatmul.mubr.f32.gmra.mrb[26].mxu0 %v363_v2 }
  0x76   : > { %1712 = vmatprep.mubr.msk.f32.mxu0 %vm407_vm0, %v366_v4 }
  0x79   : > { %600 = vmatmul.mubr.f32.gmra.mrb[28].mxu0 %v365_v5 }
  0x7a   : > { %1713 = vmatprep.mubr.msk.f32.mxu0 %vm407_vm0, %v368_v6 }
  0x7d   : > { %605 = vmatmul.mubr.f32.gmra.mrb[30].mxu0 %v367_v7 }
  0x7e   : > { %1714 = vmatprep.mubr.msk.f32.mxu0 %vm407_vm0, %v370_v8 }
  0x81   : > { %610 = vmatmul.mubr.f32.gmra.mrb[32].mxu0 %v369_v9 }
  0x82   : > { %1715 = vmatprep.mubr.msk.f32.mxu0 %vm407_vm0, %v372_v10 }
  0x85   : > { %615 = vmatmul.mubr.f32.gmra.mrb[34].mxu0 %v371_v11 }
  0x86   : > { %1716 = vmatprep.mubr.msk.f32.mxu0 %vm407_vm0, %v374_v12 }
  0x89   : > { %620 = vmatmul.mubr.f32.gmra.mrb[36].mxu0 %v373_v13 }
  0x8a   : > { %1461 = vmatprep.mubr.f32.mxu0 %v2231_v38 }
 0x114   : > { %v531_v19 = vpop.f32.mrb[0].mxu0 }
 0x115   : > { %v532_v20 = vadd.f32 %v2505_v18, %v531_v19  ;;  %v533_v21 = vpop.f32.mrb[1].mxu0 }
 0x117   : > { %v625_v22 = vmul.f32 0.5, %v532_v20 }
 0x118   : > { %v536_v23 = vpop.f32.mrb[2].mxu0 }
 0x119   : > { %2052 = vtanh.f32 %v625_v22  ;;  %v537_v24 = vadd.f32 %v2505_v18, %v536_v23  ;;  %v538_v25 = vpop.f32.mrb[3].mxu0 }
 0x11b   : > { %v626_v26 = vmul.f32 0.5, %v537_v24 }
 0x11c   : > { %v541_v27 = vpop.f32.mrb[4].mxu0 }
 0x11d   : > { %2054 = vtanh.f32 %v626_v26  ;;  %v542_v3 = vadd.f32 %v2505_v18, %v541_v27  ;;  %v543_v28 = vpop.f32.mrb[5].mxu0 }
 0x11f   : > { %v627_v29 = vmul.f32 0.5, %v542_v3 }
 0x120   : > { %v546_v30 = vpop.f32.mrb[6].mxu0 }
 0x121   : > { %2056 = vtanh.f32 %v627_v29  ;;  %v547_v31 = vadd.f32 %v2505_v18, %v546_v30  ;;  %v548_v32 = vpop.f32.mrb[7].mxu0 }
 0x123   : > { %v2053_v35 = vpop.eup %2052  ;;  %v628_v36 = vmul.f32 0.5, %v547_v31 }
 0x124   : > { %v663_v37 = vmul.f32 0.5, %v2053_v35  ;;  %v551_v39 = vpop.f32.mrb[8].mxu0 }
 0x125   : > { %2058 = vtanh.f32 %v628_v36  ;;  %v552_v40 = vadd.f32 %v2505_v18, %v551_v39  ;;  %v553_v41 = vpop.f32.mrb[9].mxu0 }
 0x126   : > { %v682_v43 = vadd.f32 0.5, %v663_v37 }
 0x127   : > { %v2055_v44 = vpop.eup %2054  ;;  %v629_v45 = vmul.f32 0.5, %v552_v40 }
 0x128   : > { %v664_v46 = vmul.f32 0.5, %v2055_v44  ;;  %v556_v47 = vpop.f32.mrb[10].mxu0  ;;  %1838 = vmatmul.mubr.msk.f32.vlgmr.msra.gmra.mrb[0].mxu1 %vm711_vm4, %v682_v43 }
 0x129   : > { %2060 = vtanh.f32 %v629_v45  ;;  %v557_v48 = vadd.f32 %v2505_v18, %v556_v47  ;;  %v558_v49 = vpop.f32.mrb[11].mxu0  ;;  %1840 = vmatprep.mubr.msk.f32.mxu1 %vm2232_vm2, %v2231_v38  ;;  %1997 = vmatpush3.bf16.msk.msra.mxu1 %vm1996_vm6, %v1995_v42 }
 0x12a   : > { %v683_v50 = vadd.f32 0.5, %v664_v46 }
 0x12b   : > { %v2057_v51 = vpop.eup %2056  ;;  %v630_v52 = vmul.f32 0.5, %v557_v48 }
 0x12c   : > { %v665_v53 = vmul.f32 0.5, %v2057_v51  ;;  %v561_v54 = vpop.f32.mrb[12].mxu0  ;;  %1841 = vmatmul.mubr.msk.f32.gmra.mrb[2].mxu1 %vm711_vm4, %v683_v50 }
 0x12d   : > { %2062 = vtanh.f32 %v630_v52  ;;  %v562_v55 = vadd.f32 %v2505_v18, %v561_v54  ;;  %v563_v56 = vpop.f32.mrb[13].mxu0  ;;  %1843 = vmatprep.mubr.msk.f32.mxu1 %vm2232_vm2, %v2231_v38 }
 0x12e   : > { %v684_v57 = vadd.f32 0.5, %v665_v53 }
 0x12f   : > { %v2059_v58 = vpop.eup %2058  ;;  %v631_v59 = vmul.f32 0.5, %v562_v55 }
 0x130   : > { %v666_v60 = vmul.f32 0.5, %v2059_v58  ;;  %v566_v61 = vpop.f32.mrb[14].mxu0  ;;  %1844 = vmatmul.mubr.msk.f32.gmra.mrb[4].mxu1 %vm711_vm4, %v684_v57 }
 0x131   : > { %2064 = vtanh.f32 %v631_v59  ;;  %v567_v62 = vadd.f32 %v2505_v18, %v566_v61  ;;  %v568_v63 = vpop.f32.mrb[15].mxu0  ;;  %1846 = vmatprep.mubr.msk.f32.mxu1 %vm2232_vm2, %v2231_v38 }
 0x132   : > { %v685_v0 = vadd.f32 0.5, %v666_v60 }
 0x133   : > { %v2061_v1 = vpop.eup %2060  ;;  %v632_v2 = vmul.f32 0.5, %v567_v62 }
 0x134   : > { %v667_v4 = vmul.f32 0.5, %v2061_v1  ;;  %v571_v5 = vpop.f32.mrb[16].mxu0  ;;  %1847 = vmatmul.mubr.msk.f32.gmra.mrb[6].mxu1 %vm711_vm4, %v685_v0 }
 0x135   : > { %2066 = vtanh.f32 %v632_v2  ;;  %v572_v6 = vadd.f32 %v2505_v18, %v571_v5  ;;  %v573_v7 = vpop.f32.mrb[17].mxu0  ;;  %1849 = vmatprep.mubr.msk.f32.mxu1 %vm2232_vm2, %v2231_v38 }
 0x136   : > { %v686_v8 = vadd.f32 0.5, %v667_v4 }
 0x137   : > { %v2063_v9 = vpop.eup %2062  ;;  %v633_v10 = vmul.f32 0.5, %v572_v6 }
 0x138   : > { %v668_v11 = vmul.f32 0.5, %v2063_v9  ;;  %v576_v12 = vpop.f32.mrb[18].mxu0  ;;  %1850 = vmatmul.mubr.msk.f32.gmra.mrb[8].mxu1 %vm711_vm4, %v686_v8 }
 0x139   : > { %2068 = vtanh.f32 %v633_v10  ;;  %v577_v13 = vadd.f32 %v2505_v18, %v576_v12  ;;  %v578_v14 = vpop.f32.mrb[19].mxu0  ;;  %1852 = vmatprep.mubr.msk.f32.mxu1 %vm2232_vm2, %v2231_v38 }
 0x13a   : > { %v687_v15 = vadd.f32 0.5, %v668_v11 }
 0x13b   : > { %v2065_v16 = vpop.eup %2064  ;;  %v634_v17 = vmul.f32 0.5, %v577_v13 }
 0x13c   : > { %v669_v19 = vmul.f32 0.5, %v2065_v16  ;;  %v581_v20 = vpop.f32.mrb[20].mxu0  ;;  %1853 = vmatmul.mubr.msk.f32.gmra.mrb[10].mxu1 %vm711_vm4, %v687_v15 }
 0x13d   : > { %2070 = vtanh.f32 %v634_v17  ;;  %v582_v21 = vadd.f32 %v2505_v18, %v581_v20  ;;  %v583_v22 = vpop.f32.mrb[21].mxu0  ;;  %1855 = vmatprep.mubr.msk.f32.mxu1 %vm2232_vm2, %v2231_v38 }
 0x13e   : > { %v688_v23 = vadd.f32 0.5, %v669_v19 }
 0x13f   : > { %v2067_v24 = vpop.eup %2066  ;;  %v635_v25 = vmul.f32 0.5, %v582_v21 }
 0x140   : > { %v670_v26 = vmul.f32 0.5, %v2067_v24  ;;  %v586_v27 = vpop.f32.mrb[22].mxu0  ;;  %1856 = vmatmul.mubr.msk.f32.gmra.mrb[12].mxu1 %vm711_vm4, %v688_v23 }
 0x141   : > { %2072 = vtanh.f32 %v635_v25  ;;  %v587_v3 = vadd.f32 %v2505_v18, %v586_v27  ;;  %v588_v28 = vpop.f32.mrb[23].mxu0  ;;  %1858 = vmatprep.mubr.msk.f32.mxu1 %vm2232_vm2, %v2231_v38 }
 0x142   : > { %v689_v29 = vadd.f32 0.5, %v670_v26 }
 0x143   : > { %v2069_v30 = vpop.eup %2068  ;;  %v636_v31 = vmul.f32 0.5, %v587_v3 }
 0x144   : > { %v671_v32 = vmul.f32 0.5, %v2069_v30  ;;  %v591_v33 = vpop.f32.mrb[24].mxu0  ;;  %1859 = vmatmul.mubr.msk.f32.gmra.mrb[14].mxu1 %vm711_vm4, %v689_v29  ;;  %v1317_v29 = vld [vmem:[%s2898_s7 + $0x8] sm:$0xff]  ;;  %v1319_v30 = vld [vmem:[%s2898_s7 + $0x18] sm:$0xff] }
 0x145   : > { %2074 = vtanh.f32 %v636_v31  ;;  %v592_v34 = vadd.f32 %v2505_v18, %v591_v33  ;;  %v593_v35 = vpop.f32.mrb[25].mxu0  ;;  %1861 = vmatprep.mubr.msk.f32.mxu1 %vm2232_vm2, %v2231_v38  ;;  %v1316_v31 = vld [vmem:[%s2898_s7] sm:$0xff]  ;;  %v1318_v33 = vld [vmem:[%s2898_s7 + $0x10] sm:$0xff] }
 0x146   : > { %v690_v36 = vadd.f32 0.5, %v671_v32  ;;  %v1998_v32 = vpack.c.bf16 %v1319_v30, %v1317_v29  ;;  %v2604_v35 = vld [vmem:[%s2895_s4] ss:$0 sm:$0xff] }
 0x147   : > { %v2071_v37 = vpop.eup %2070  ;;  %v637_v39 = vmul.f32 0.5, %v592_v34  ;;  %v2000_v34 = vpack.c.bf16 %v1318_v33, %v1316_v31 }
 0x148   : > { %v672_v40 = vmul.f32 0.5, %v2071_v37  ;;  %v596_v41 = vpop.f32.mrb[26].mxu0  ;;  %1862 = vmatmul.mubr.msk.f32.gmra.mrb[16].mxu1 %vm711_vm4, %v690_v36  ;;  %1999 = vmatprep.subr.bf16.mxu0 %v1998_v32 }
 0x149   : > { %2076 = vtanh.f32 %v637_v39  ;;  %v597_v42 = vadd.f32 %v2505_v18, %v596_v41  ;;  %v598_v43 = vpop.f32.mrb[27].mxu0  ;;  %1864 = vmatprep.mubr.msk.f32.mxu1 %vm2232_vm2, %v2231_v38  ;;  %2002 = vmatprep.subr.bf16.mxu1 %v1998_v32 }
 0x14a   : > { %v691_v44 = vadd.f32 0.5, %v672_v40  ;;  %2001 = vmatpush1.bf16.msra.mxu0 %v2000_v34 }
 0x14b   : > { %v2073_v45 = vpop.eup %2072  ;;  %v638_v46 = vmul.f32 0.5, %v597_v42 }
 0x14c   : > { %v673_v47 = vmul.f32 0.5, %v2073_v45  ;;  %v601_v48 = vpop.f32.mrb[28].mxu0  ;;  %1865 = vmatmul.mubr.msk.f32.gmra.mrb[18].mxu1 %vm711_vm4, %v691_v44 }
 0x14d   : > { %2078 = vtanh.f32 %v638_v46  ;;  %v602_v49 = vadd.f32 %v2505_v18, %v601_v48  ;;  %v603_v50 = vpop.f32.mrb[29].mxu0  ;;  %1867 = vmatprep.mubr.msk.f32.mxu1 %vm2232_vm2, %v2231_v38 }
 0x14e   : > { %v692_v51 = vadd.f32 0.5, %v673_v47 }
 0x14f   : > { %v2075_v52 = vpop.eup %2074  ;;  %v639_v53 = vmul.f32 0.5, %v602_v49 }
 0x150   : > { %v674_v54 = vmul.f32 0.5, %v2075_v52  ;;  %v606_v55 = vpop.f32.mrb[30].mxu0  ;;  %1868 = vmatmul.mubr.msk.f32.gmra.mrb[20].mxu1 %vm711_vm4, %v692_v51 }
 0x151   : > { %2080 = vtanh.f32 %v639_v53  ;;  %v607_v56 = vadd.f32 %v2505_v18, %v606_v55  ;;  %v608_v57 = vpop.f32.mrb[31].mxu0  ;;  %1870 = vmatprep.mubr.msk.f32.mxu1 %vm2232_vm2, %v2231_v38 }
 0x152   : > { %v693_v58 = vadd.f32 0.5, %v674_v54 }
 0x153   : > { %v2077_v59 = vpop.eup %2076  ;;  %v640_v60 = vmul.f32 0.5, %v607_v56 }
 0x154   : > { %v675_v61 = vmul.f32 0.5, %v2077_v59  ;;  %v611_v62 = vpop.f32.mrb[32].mxu0  ;;  %1871 = vmatmul.mubr.msk.f32.gmra.mrb[22].mxu1 %vm711_vm4, %v693_v58 }
 0x155   : > { %2082 = vtanh.f32 %v640_v60  ;;  %v612_v63 = vadd.f32 %v2505_v18, %v611_v62  ;;  %v613_v0 = vpop.f32.mrb[33].mxu0  ;;  %1873 = vmatprep.mubr.msk.f32.mxu1 %vm2232_vm2, %v2231_v38 }
 0x156   : > { %v694_v1 = vadd.f32 0.5, %v675_v61 }
 0x157   : > { %v2079_v2 = vpop.eup %2078  ;;  %v641_v4 = vmul.f32 0.5, %v612_v63 }
 0x158   : > { %v676_v5 = vmul.f32 0.5, %v2079_v2  ;;  %v616_v6 = vpop.f32.mrb[34].mxu0  ;;  %1874 = vmatmul.mubr.msk.f32.gmra.mrb[24].mxu1 %vm711_vm4, %v694_v1 }
 0x159   : > { %2084 = vtanh.f32 %v641_v4  ;;  %v617_v7 = vadd.f32 %v2505_v18, %v616_v6  ;;  %v618_v8 = vpop.f32.mrb[35].mxu0  ;;  %1876 = vmatprep.mubr.msk.f32.mxu1 %vm2232_vm2, %v2231_v38 }
 0x15a   : > { %v695_v9 = vadd.f32 0.5, %v676_v5 }
 0x15b   : > { %v2081_v10 = vpop.eup %2080  ;;  %v642_v11 = vmul.f32 0.5, %v617_v7 }
 0x15c   : > { %v677_v12 = vmul.f32 0.5, %v2081_v10  ;;  %v621_v13 = vpop.f32.mrb[36].mxu0  ;;  %1877 = vmatmul.mubr.msk.f32.gmra.mrb[26].mxu1 %vm711_vm4, %v695_v9 }
 0x15d   : > { %2086 = vtanh.f32 %v642_v11  ;;  %v622_v14 = vadd.f32 %v2505_v18, %v621_v13  ;;  %v623_v15 = vpop.f32.mrb[37].mxu0  ;;  %1879 = vmatprep.mubr.msk.f32.mxu1 %vm2232_vm2, %v2231_v38 }
 0x15e   : > { %v696_v16 = vadd.f32 0.5, %v677_v12 }
 0x15f   : > { %v2083_v17 = vpop.eup %2082  ;;  %v643_v19 = vmul.f32 0.5, %v622_v14 }
 0x160   : > { %v678_v20 = vmul.f32 0.5, %v2083_v17  ;;  %1880 = vmatmul.mubr.msk.f32.gmra.mrb[28].mxu1 %vm711_vm4, %v696_v16 }
 0x161   : > { %2088 = vtanh.f32 %v643_v19  ;;  %1882 = vmatprep.mubr.msk.f32.mxu1 %vm2232_vm2, %v2231_v38 }
 0x162   : > { %v697_v21 = vadd.f32 0.5, %v678_v20 }
 0x163   : > { %v2085_v22 = vpop.eup %2084 }
 0x164   : > { %v679_v23 = vmul.f32 0.5, %v2085_v22  ;;  %1883 = vmatmul.mubr.msk.f32.gmra.mrb[30].mxu1 %vm711_vm4, %v697_v21 }
 0x165   : > { %1885 = vmatprep.mubr.msk.f32.mxu1 %vm2232_vm2, %v2231_v38 }
 0x166   : > { %v698_v18 = vadd.f32 0.5, %v679_v23 }
 0x167   : > { %v2087_v24 = vpop.eup %2086 }
 0x168   : > { %v680_v25 = vmul.f32 0.5, %v2087_v24  ;;  %1886 = vmatmul.mubr.msk.f32.gmra.mrb[32].mxu1 %vm711_vm4, %v698_v18 }
 0x169   : > { %1888 = vmatprep.mubr.msk.f32.mxu1 %vm2232_vm2, %v2231_v38 }
 0x16a   : > { %v699_v26 = vadd.f32 0.5, %v680_v25 }
 0x16b   : > { %v2089_v27 = vpop.eup %2088 }
 0x16c   : > { %v681_v3 = vmul.f32 0.5, %v2089_v27  ;;  %1889 = vmatmul.mubr.msk.f32.gmra.mrb[34].mxu1 %vm711_vm4, %v699_v26 }
 0x16d   : > { %1891 = vmatprep.mubr.msk.f32.mxu1 %vm2232_vm2, %v2231_v38 }
 0x16e   : > { %v700_v28 = vadd.f32 0.5, %v681_v3 }
 0x170   : > { %1892 = vmatmul.mubr.msk.f32.gmra.mrb[36].mxu1 %vm711_vm4, %v700_v28 }
 0x171   : > { %1898 = vmatprep.mubr.msk.f32.mxu1 %vm2232_vm2, %v2231_v38 }
 0x1fb   : > { %v839_v36 = vpop.f32.mrb[0].mxu1 }
 0x1fc   : > { %v840_v37 = vadd.f32 %v2604_v35, %v839_v36  ;;  %v1839_v39 = vpop.f32.mrb[1].mxu1 }
 0x1fe   : > { %v933_v40 = vmul.f32 0.5, %v840_v37 }
 0x1ff   : > { %v844_v41 = vpop.f32.mrb[2].mxu1 }
 0x200   : > { %2090 = vtanh.f32 %v933_v40  ;;  %v845_v42 = vadd.f32 %v2604_v35, %v844_v41  ;;  %v1842_v43 = vpop.f32.mrb[3].mxu1 }
 0x202   : > { %v934_v44 = vmul.f32 0.5, %v845_v42 }
 0x203   : > { %v849_v45 = vpop.f32.mrb[4].mxu1 }
 0x204   : > { %2092 = vtanh.f32 %v934_v44  ;;  %v850_v46 = vadd.f32 %v2604_v35, %v849_v45  ;;  %v1845_v47 = vpop.f32.mrb[5].mxu1 }
 0x206   : > { %v935_v48 = vmul.f32 0.5, %v850_v46 }
 0x207   : > { %v854_v49 = vpop.f32.mrb[6].mxu1 }
 0x208   : > { %2094 = vtanh.f32 %v935_v48  ;;  %v855_v50 = vadd.f32 %v2604_v35, %v854_v49  ;;  %v1848_v51 = vpop.f32.mrb[7].mxu1 }
 0x20a   : > { %v2091_v52 = vpop.eup %2090  ;;  %v936_v53 = vmul.f32 0.5, %v855_v50 }
 0x20b   : > { %v971_v54 = vmul.f32 0.5, %v2091_v52  ;;  %v859_v55 = vpop.f32.mrb[8].mxu1 }
 0x20c   : > { %2096 = vtanh.f32 %v936_v53  ;;  %v860_v56 = vadd.f32 %v2604_v35, %v859_v55  ;;  %v1851_v57 = vpop.f32.mrb[9].mxu1 }
 0x20d   : > { %v990_v58 = vadd.f32 0.5, %v971_v54 }
 0x20e   : > { %v2093_v59 = vpop.eup %2092  ;;  %v937_v60 = vmul.f32 0.5, %v860_v56 }
 0x20f   : > { %v972_v61 = vmul.f32 0.5, %v2093_v59  ;;  %v864_v62 = vpop.f32.mrb[10].mxu1  ;;  %1899 = vmatmul.mubr.msk.f32.vlgmr.msra.gmra.mrb[38].mxu1 %vm1018_vm7, %v990_v58 }
 0x210   : > { %2098 = vtanh.f32 %v937_v60  ;;  %v865_v63 = vadd.f32 %v2604_v35, %v864_v62  ;;  %v1854_v0 = vpop.f32.mrb[11].mxu1  ;;  %1901 = vmatprep.mubr.msk.f32.mxu1 %vm2232_vm2, %v2231_v38  ;;  %2004 = vmatpush1.bf16.msra.mxu1 %v2000_v34 }
 0x211   : > { %v991_v1 = vadd.f32 0.5, %v972_v61 }
 0x212   : > { %v2095_v2 = vpop.eup %2094  ;;  %v938_v4 = vmul.f32 0.5, %v865_v63 }
 0x213   : > { %v973_v5 = vmul.f32 0.5, %v2095_v2  ;;  %v869_v6 = vpop.f32.mrb[12].mxu1  ;;  %1902 = vmatmul.mubr.msk.f32.gmra.mrb[40].mxu1 %vm1018_vm7, %v991_v1 }
 0x214   : > { %2100 = vtanh.f32 %v938_v4  ;;  %v870_v7 = vadd.f32 %v2604_v35, %v869_v6  ;;  %v1857_v8 = vpop.f32.mrb[13].mxu1  ;;  %1904 = vmatprep.mubr.msk.f32.mxu1 %vm2232_vm2, %v2231_v38 }
 0x215   : > { %v992_v9 = vadd.f32 0.5, %v973_v5 }
 0x216   : > { %v2097_v10 = vpop.eup %2096  ;;  %v939_v11 = vmul.f32 0.5, %v870_v7 }
 0x217   : > { %v974_v12 = vmul.f32 0.5, %v2097_v10  ;;  %v874_v13 = vpop.f32.mrb[14].mxu1  ;;  %1905 = vmatmul.mubr.msk.f32.gmra.mrb[42].mxu1 %vm1018_vm7, %v992_v9 }
 0x218   : > { %2102 = vtanh.f32 %v939_v11  ;;  %v875_v14 = vadd.f32 %v2604_v35, %v874_v13  ;;  %v1860_v15 = vpop.f32.mrb[15].mxu1  ;;  %1907 = vmatprep.mubr.msk.f32.mxu1 %vm2232_vm2, %v2231_v38 }
 0x219   : > { %v993_v16 = vadd.f32 0.5, %v974_v12 }
 0x21a   : > { %v2099_v17 = vpop.eup %2098  ;;  %v940_v19 = vmul.f32 0.5, %v875_v14 }
 0x21b   : > { %v975_v20 = vmul.f32 0.5, %v2099_v17  ;;  %v879_v21 = vpop.f32.mrb[16].mxu1  ;;  %1908 = vmatmul.mubr.msk.f32.gmra.mrb[44].mxu1 %vm1018_vm7, %v993_v16 }
 0x21c   : > { %2104 = vtanh.f32 %v940_v19  ;;  %v880_v22 = vadd.f32 %v2604_v35, %v879_v21  ;;  %v1863_v23 = vpop.f32.mrb[17].mxu1  ;;  %1910 = vmatprep.mubr.msk.f32.mxu1 %vm2232_vm2, %v2231_v38 }
 0x21d   : > { %v994_v18 = vadd.f32 0.5, %v975_v20 }
 0x21e   : > { %v2101_v24 = vpop.eup %2100  ;;  %v941_v25 = vmul.f32 0.5, %v880_v22 }
 0x21f   : > { %v976_v26 = vmul.f32 0.5, %v2101_v24  ;;  %v884_v27 = vpop.f32.mrb[18].mxu1  ;;  %1911 = vmatmul.mubr.msk.f32.gmra.mrb[46].mxu1 %vm1018_vm7, %v994_v18 }
 0x220   : > { %2106 = vtanh.f32 %v941_v25  ;;  %v885_v3 = vadd.f32 %v2604_v35, %v884_v27  ;;  %v1866_v28 = vpop.f32.mrb[19].mxu1  ;;  %1913 = vmatprep.mubr.msk.f32.mxu1 %vm2232_vm2, %v2231_v38 }
 0x221   : > { %v995_v29 = vadd.f32 0.5, %v976_v26 }
 0x222   : > { %v2103_v30 = vpop.eup %2102  ;;  %v942_v31 = vmul.f32 0.5, %v885_v3 }
 0x223   : > { %v977_v32 = vmul.f32 0.5, %v2103_v30  ;;  %v889_v33 = vpop.f32.mrb[20].mxu1  ;;  %1914 = vmatmul.mubr.msk.f32.gmra.mrb[48].mxu1 %vm1018_vm7, %v995_v29 }
 0x224   : > { %2108 = vtanh.f32 %v942_v31  ;;  %v890_v34 = vadd.f32 %v2604_v35, %v889_v33  ;;  %v1869_v36 = vpop.f32.mrb[21].mxu1  ;;  %1916 = vmatprep.mubr.msk.f32.mxu1 %vm2232_vm2, %v2231_v38 }
 0x225   : > { %v996_v37 = vadd.f32 0.5, %v977_v32 }
 0x226   : > { %v2105_v39 = vpop.eup %2104  ;;  %v943_v40 = vmul.f32 0.5, %v890_v34 }
 0x227   : > { %v978_v41 = vmul.f32 0.5, %v2105_v39  ;;  %v894_v42 = vpop.f32.mrb[22].mxu1  ;;  %1917 = vmatmul.mubr.msk.f32.gmra.mrb[50].mxu1 %vm1018_vm7, %v996_v37 }
 0x228   : > { %2110 = vtanh.f32 %v943_v40  ;;  %v895_v43 = vadd.f32 %v2604_v35, %v894_v42  ;;  %v1872_v44 = vpop.f32.mrb[23].mxu1  ;;  %1919 = vmatprep.mubr.msk.f32.mxu1 %vm2232_vm2, %v2231_v38 }
 0x229   : > { %v997_v45 = vadd.f32 0.5, %v978_v41 }
 0x22a   : > { %v2107_v46 = vpop.eup %2106  ;;  %v944_v47 = vmul.f32 0.5, %v895_v43 }
 0x22b   : > { %v979_v48 = vmul.f32 0.5, %v2107_v46  ;;  %v899_v49 = vpop.f32.mrb[24].mxu1  ;;  %1920 = vmatmul.mubr.msk.f32.gmra.mrb[52].mxu1 %vm1018_vm7, %v997_v45  ;;  %v1321_v45 = vld [vmem:[%s2898_s7 + $0x28] sm:$0xf]  ;;  %v1320_v46 = vld [vmem:[%s2898_s7 + $0x20] sm:$0xf] }
 0x22c   : > { %2112 = vtanh.f32 %v944_v47  ;;  %v900_v50 = vadd.f32 %v2604_v35, %v899_v49  ;;  %v1875_v51 = vpop.f32.mrb[25].mxu1  ;;  %1922 = vmatprep.mubr.msk.f32.mxu1 %vm2232_vm2, %v2231_v38  ;;  %1759 = vmatprep.subr.msk.mxu0 %vm769_vm1, %v1321_v45  ;;  %v2694_v47 = vld [vmem:[%s2897_s6] ss:$0 sm:$0xff] }
 0x22d   : > { %v998_v52 = vadd.f32 0.5, %v979_v48  ;;  %2003 = vmatprep.subr.msk.mxu1 %vm769_vm1, %v1321_v45  ;;  %1760 = vmatpush1.msk.msra.mxu0 %vm769_vm1, %v1320_v46 }
 0x22e   : > { %v2109_v53 = vpop.eup %2108  ;;  %v945_v54 = vmul.f32 0.5, %v900_v50  ;;  %2005 = vmatpush1.msk.msra.mxu1 %vm769_vm1, %v1320_v46 }
 0x22f   : > { %v980_v55 = vmul.f32 0.5, %v2109_v53  ;;  %v904_v56 = vpop.f32.mrb[26].mxu1  ;;  %1923 = vmatmul.mubr.msk.f32.gmra.mrb[54].mxu1 %vm1018_vm7, %v998_v52 }
 0x230   : > { %2114 = vtanh.f32 %v945_v54  ;;  %v905_v57 = vadd.f32 %v2604_v35, %v904_v56  ;;  %v1878_v58 = vpop.f32.mrb[27].mxu1  ;;  %1925 = vmatprep.mubr.msk.f32.mxu1 %vm2232_vm2, %v2231_v38 }
 0x231   : > { %v999_v59 = vadd.f32 0.5, %v980_v55 }
 0x232   : > { %v2111_v60 = vpop.eup %2110  ;;  %v946_v61 = vmul.f32 0.5, %v905_v57 }
 0x233   : > { %v981_v62 = vmul.f32 0.5, %v2111_v60  ;;  %v909_v63 = vpop.f32.mrb[28].mxu1  ;;  %1926 = vmatmul.mubr.msk.f32.gmra.mrb[56].mxu1 %vm1018_vm7, %v999_v59 }
 0x234   : > { %2116 = vtanh.f32 %v946_v61  ;;  %v910_v0 = vadd.f32 %v2604_v35, %v909_v63  ;;  %v1881_v1 = vpop.f32.mrb[29].mxu1  ;;  %1928 = vmatprep.mubr.msk.f32.mxu1 %vm2232_vm2, %v2231_v38 }
 0x235   : > { %v1000_v2 = vadd.f32 0.5, %v981_v62 }
 0x236   : > { %v2113_v4 = vpop.eup %2112  ;;  %v947_v5 = vmul.f32 0.5, %v910_v0 }
 0x237   : > { %v982_v6 = vmul.f32 0.5, %v2113_v4  ;;  %v914_v7 = vpop.f32.mrb[30].mxu1  ;;  %1929 = vmatmul.mubr.msk.f32.gmra.mrb[58].mxu1 %vm1018_vm7, %v1000_v2 }
 0x238   : > { %2118 = vtanh.f32 %v947_v5  ;;  %v915_v8 = vadd.f32 %v2604_v35, %v914_v7  ;;  %v1884_v9 = vpop.f32.mrb[31].mxu1  ;;  %1931 = vmatprep.mubr.msk.f32.mxu1 %vm2232_vm2, %v2231_v38 }
 0x239   : > { %v1001_v10 = vadd.f32 0.5, %v982_v6 }
 0x23a   : > { %v2115_v11 = vpop.eup %2114  ;;  %v948_v12 = vmul.f32 0.5, %v915_v8 }
 0x23b   : > { %v983_v13 = vmul.f32 0.5, %v2115_v11  ;;  %v919_v14 = vpop.f32.mrb[32].mxu1  ;;  %1932 = vmatmul.mubr.msk.f32.gmra.mrb[60].mxu1 %vm1018_vm7, %v1001_v10 }
 0x23c   : > { %2120 = vtanh.f32 %v948_v12  ;;  %v920_v15 = vadd.f32 %v2604_v35, %v919_v14  ;;  %v1887_v16 = vpop.f32.mrb[33].mxu1  ;;  %1934 = vmatprep.mubr.msk.f32.mxu1 %vm2232_vm2, %v2231_v38 }
 0x23d   : > { %v1002_v17 = vadd.f32 0.5, %v983_v13 }
 0x23e   : > { %v2117_v19 = vpop.eup %2116  ;;  %v949_v20 = vmul.f32 0.5, %v920_v15 }
 0x23f   : > { %v984_v21 = vmul.f32 0.5, %v2117_v19  ;;  %v924_v22 = vpop.f32.mrb[34].mxu1  ;;  %1935 = vmatmul.mubr.msk.f32.gmra.mrb[62].mxu1 %vm1018_vm7, %v1002_v17 }
 0x240   : > { %2122 = vtanh.f32 %v949_v20  ;;  %v925_v23 = vadd.f32 %v2604_v35, %v924_v22  ;;  %v1890_v18 = vpop.f32.mrb[35].mxu1  ;;  %1937 = vmatprep.mubr.msk.f32.mxu1 %vm2232_vm2, %v2231_v38 }
 0x241   : > { %v1003_v24 = vadd.f32 0.5, %v984_v21 }
 0x242   : > { %v2119_v25 = vpop.eup %2118  ;;  %v950_v26 = vmul.f32 0.5, %v925_v23 }
 0x243   : > { %v985_v27 = vmul.f32 0.5, %v2119_v25  ;;  %v929_v3 = vpop.f32.mrb[36].mxu1  ;;  %1938 = vmatmul.mubr.msk.f32.gmra.mrb[64].mxu1 %vm1018_vm7, %v1003_v24 }
 0x244   : > { %2124 = vtanh.f32 %v950_v26  ;;  %v930_v28 = vadd.f32 %v2604_v35, %v929_v3  ;;  %v1893_v29 = vpop.f32.mrb[37].mxu1  ;;  %1940 = vmatprep.mubr.msk.f32.mxu1 %vm2232_vm2, %v2231_v38 }
 0x245   : > { %v1004_v30 = vadd.f32 0.5, %v985_v27 }
 0x246   : > { %v2121_v31 = vpop.eup %2120  ;;  %v951_v32 = vmul.f32 0.5, %v930_v28 }
 0x247   : > { %v986_v33 = vmul.f32 0.5, %v2121_v31  ;;  %1941 = vmatmul.mubr.msk.f32.gmra.mrb[66].mxu1 %vm1018_vm7, %v1004_v30 }
 0x248   : > { %2126 = vtanh.f32 %v951_v32  ;;  %1943 = vmatprep.mubr.msk.f32.mxu1 %vm2232_vm2, %v2231_v38 }
 0x249   : > { %v1005_v34 = vadd.f32 0.5, %v986_v33 }
 0x24a   : > { %v2123_v36 = vpop.eup %2122 }
 0x24b   : > { %v987_v37 = vmul.f32 0.5, %v2123_v36  ;;  %1944 = vmatmul.mubr.msk.f32.gmra.mrb[68].mxu1 %vm1018_vm7, %v1005_v34 }
 0x24c   : > { %1946 = vmatprep.mubr.msk.f32.mxu1 %vm2232_vm2, %v2231_v38 }
 0x24d   : > { %v1006_v35 = vadd.f32 0.5, %v987_v37 }
 0x24e   : > { %v2125_v39 = vpop.eup %2124 }
 0x24f   : > { %v988_v40 = vmul.f32 0.5, %v2125_v39  ;;  %1947 = vmatmul.mubr.msk.f32.gmra.mrb[70].mxu1 %vm1018_vm7, %v1006_v35 }
 0x250   : > { %1949 = vmatprep.mubr.msk.f32.mxu1 %vm2232_vm2, %v2231_v38 }
 0x251   : > { %v1007_v41 = vadd.f32 0.5, %v988_v40 }
 0x252   : > { %v2127_v42 = vpop.eup %2126 }
 0x253   : > { %v989_v43 = vmul.f32 0.5, %v2127_v42  ;;  %1950 = vmatmul.mubr.msk.f32.gmra.mrb[72].mxu1 %vm1018_vm7, %v1007_v41 }
 0x254   : > { %1952 = vmatprep.mubr.msk.f32.mxu1 %vm2232_vm2, %v2231_v38 }
 0x255   : > { %v1008_v44 = vadd.f32 0.5, %v989_v43 }
 0x257   : > { %1953 = vmatmul.mubr.msk.f32.gmra.mrb[74].mxu1 %vm1018_vm7, %v1008_v44 }
 0x258   : > { %1545 = vmatprep.mubr.f32.mxu1 %v2231_v38 }
 0x2e2   : > { %v1146_v48 = vpop.f32.mrb[38].mxu1 }
 0x2e3   : > { %v1147_v49 = vadd.f32 %v2694_v47, %v1146_v48  ;;  %v1900_v50 = vpop.f32.mrb[39].mxu1 }
 0x2e5   : > { %v1240_v51 = vmul.f32 0.5, %v1147_v49 }
 0x2e6   : > { %v1151_v52 = vpop.f32.mrb[40].mxu1 }
 0x2e7   : > { %2128 = vtanh.f32 %v1240_v51  ;;  %v1152_v53 = vadd.f32 %v2694_v47, %v1151_v52  ;;  %v1903_v54 = vpop.f32.mrb[41].mxu1 }
 0x2e9   : > { %v1241_v55 = vmul.f32 0.5, %v1152_v53 }
 0x2ea   : > { %v1156_v56 = vpop.f32.mrb[42].mxu1 }
 0x2eb   : > { %2130 = vtanh.f32 %v1241_v55  ;;  %v1157_v57 = vadd.f32 %v2694_v47, %v1156_v56  ;;  %v1906_v58 = vpop.f32.mrb[43].mxu1 }
 0x2ed   : > { %v1242_v59 = vmul.f32 0.5, %v1157_v57 }
 0x2ee   : > { %v1161_v60 = vpop.f32.mrb[44].mxu1 }
 0x2ef   : > { %2132 = vtanh.f32 %v1242_v59  ;;  %v1162_v61 = vadd.f32 %v2694_v47, %v1161_v60  ;;  %v1909_v62 = vpop.f32.mrb[45].mxu1 }
 0x2f1   : > { %v2129_v63 = vpop.eup %2128  ;;  %v1243_v0 = vmul.f32 0.5, %v1162_v61 }
 0x2f2   : > { %v1278_v1 = vmul.f32 0.5, %v2129_v63  ;;  %v1166_v2 = vpop.f32.mrb[46].mxu1 }
 0x2f3   : > { %2134 = vtanh.f32 %v1243_v0  ;;  %v1167_v4 = vadd.f32 %v2694_v47, %v1166_v2  ;;  %v1912_v5 = vpop.f32.mrb[47].mxu1 }
 0x2f4   : > { %v1297_v6 = vadd.f32 0.5, %v1278_v1 }
 0x2f5   : > { %v2131_v7 = vpop.eup %2130  ;;  %v1244_v8 = vmul.f32 0.5, %v1167_v4 }
 0x2f6   : > { %v1279_v9 = vmul.f32 0.5, %v2131_v7  ;;  %v1171_v10 = vpop.f32.mrb[48].mxu1  ;;  %1761 = vmatmul.mubr.msk.f32.vlgmr.msra.gmra.mrb[38].mxu0 %vm711_vm4, %v1297_v6 }
 0x2f7   : > { %2136 = vtanh.f32 %v1244_v8  ;;  %v1172_v11 = vadd.f32 %v2694_v47, %v1171_v10  ;;  %v1915_v12 = vpop.f32.mrb[49].mxu1  ;;  %1467 = vmatprep.mubr.f32.mxu0 %v2231_v38 }
 0x2f8   : > { %v1298_v13 = vadd.f32 0.5, %v1279_v9 }
 0x2f9   : > { %v2133_v14 = vpop.eup %2132  ;;  %v1245_v15 = vmul.f32 0.5, %v1172_v11 }
 0x2fa   : > { %v1280_v16 = vmul.f32 0.5, %v2133_v14  ;;  %v1176_v17 = vpop.f32.mrb[50].mxu1  ;;  %1762 = vmatmul.mubr.msk.f32.gmra.mrb[40].mxu0 %vm711_vm4, %v1298_v13 }
 0x2fb   : > { %2138 = vtanh.f32 %v1245_v15  ;;  %v1177_v19 = vadd.f32 %v2694_v47, %v1176_v17  ;;  %v1918_v20 = vpop.f32.mrb[51].mxu1  ;;  %1473 = vmatprep.mubr.f32.mxu0 %v2231_v38 }
 0x2fc   : > { %v1299_v21 = vadd.f32 0.5, %v1280_v16 }
 0x2fd   : > { %v2135_v22 = vpop.eup %2134  ;;  %v1246_v23 = vmul.f32 0.5, %v1177_v19 }
 0x2fe   : > { %v1281_v18 = vmul.f32 0.5, %v2135_v22  ;;  %v1181_v24 = vpop.f32.mrb[52].mxu1  ;;  %1763 = vmatmul.mubr.msk.f32.gmra.mrb[42].mxu0 %vm711_vm4, %v1299_v21 }
 0x2ff   : > { %2140 = vtanh.f32 %v1246_v23  ;;  %v1182_v25 = vadd.f32 %v2694_v47, %v1181_v24  ;;  %v1921_v26 = vpop.f32.mrb[53].mxu1  ;;  %1479 = vmatprep.mubr.f32.mxu0 %v2231_v38 }
 0x300   : > { %v1300_v27 = vadd.f32 0.5, %v1281_v18 }
 0x301   : > { %v2137_v3 = vpop.eup %2136  ;;  %v1247_v28 = vmul.f32 0.5, %v1182_v25 }
 0x302   : > { %v1282_v29 = vmul.f32 0.5, %v2137_v3  ;;  %v1186_v30 = vpop.f32.mrb[54].mxu1  ;;  %1764 = vmatmul.mubr.msk.f32.gmra.mrb[44].mxu0 %vm711_vm4, %v1300_v27 }
 0x303   : > { %2142 = vtanh.f32 %v1247_v28  ;;  %v1187_v31 = vadd.f32 %v2694_v47, %v1186_v30  ;;  %v1924_v32 = vpop.f32.mrb[55].mxu1  ;;  %1485 = vmatprep.mubr.f32.mxu0 %v2231_v38 }
 0x304   : > { %v1301_v33 = vadd.f32 0.5, %v1282_v29 }
 0x305   : > { %v2139_v34 = vpop.eup %2138  ;;  %v1248_v36 = vmul.f32 0.5, %v1187_v31 }
 0x306   : > { %v1283_v37 = vmul.f32 0.5, %v2139_v34  ;;  %v1191_v35 = vpop.f32.mrb[56].mxu1  ;;  %1765 = vmatmul.mubr.msk.f32.gmra.mrb[46].mxu0 %vm711_vm4, %v1301_v33 }
 0x307   : > { %2144 = vtanh.f32 %v1248_v36  ;;  %v1192_v39 = vadd.f32 %v2694_v47, %v1191_v35  ;;  %v1927_v40 = vpop.f32.mrb[57].mxu1  ;;  %1491 = vmatprep.mubr.f32.mxu0 %v2231_v38 }
 0x308   : > { %v1302_v41 = vadd.f32 0.5, %v1283_v37 }
 0x309   : > { %v2141_v42 = vpop.eup %2140  ;;  %v1249_v43 = vmul.f32 0.5, %v1192_v39 }
 0x30a   : > { %v1284_v44 = vmul.f32 0.5, %v2141_v42  ;;  %v1196_v45 = vpop.f32.mrb[58].mxu1  ;;  %1766 = vmatmul.mubr.msk.f32.gmra.mrb[48].mxu0 %vm711_vm4, %v1302_v41 }
 0x30b   : > { %2146 = vtanh.f32 %v1249_v43  ;;  %v1197_v46 = vadd.f32 %v2694_v47, %v1196_v45  ;;  %v1930_v48 = vpop.f32.mrb[59].mxu1  ;;  %1497 = vmatprep.mubr.f32.mxu0 %v2231_v38 }
 0x30c   : > { %v1303_v49 = vadd.f32 0.5, %v1284_v44 }
 0x30d   : > { %v2143_v50 = vpop.eup %2142  ;;  %v1250_v51 = vmul.f32 0.5, %v1197_v46 }
 0x30e   : > { %v1285_v52 = vmul.f32 0.5, %v2143_v50  ;;  %v1201_v53 = vpop.f32.mrb[60].mxu1  ;;  %1767 = vmatmul.mubr.msk.f32.gmra.mrb[50].mxu0 %vm711_vm4, %v1303_v49 }
 0x30f   : > { %2148 = vtanh.f32 %v1250_v51  ;;  %v1202_v54 = vadd.f32 %v2694_v47, %v1201_v53  ;;  %v1933_v55 = vpop.f32.mrb[61].mxu1  ;;  %1503 = vmatprep.mubr.f32.mxu0 %v2231_v38 }
 0x310   : > { %v1304_v56 = vadd.f32 0.5, %v1285_v52 }
 0x311   : > { %v2145_v57 = vpop.eup %2144  ;;  %v1251_v58 = vmul.f32 0.5, %v1202_v54 }
 0x312   : > { %v1286_v59 = vmul.f32 0.5, %v2145_v57  ;;  %v1206_v60 = vpop.f32.mrb[62].mxu1  ;;  %1768 = vmatmul.mubr.msk.f32.gmra.mrb[52].mxu0 %vm711_vm4, %v1304_v56  ;;  %v1324_v56 = vlaneseq }
 0x313   : > { %2150 = vtanh.f32 %v1251_v58  ;;  %v1207_v61 = vadd.f32 %v2694_v47, %v1206_v60  ;;  %v1936_v62 = vpop.f32.mrb[63].mxu1  ;;  %1509 = vmatprep.mubr.f32.mxu0 %v2231_v38 }
 0x314   : > { %v1305_v63 = vadd.f32 0.5, %v1286_v59  ;;  %v1325_v57 = vshrl.u32 %v1324_v56, 7  ;;  %v1322_v59 = vld [vmem:[%s2899_s8] sm:$0x3] }
 0x315   : > { %v2147_v0 = vpop.eup %2146  ;;  %v1252_v1 = vmul.f32 0.5, %v1207_v61 }
 0x316   : > { %v1287_v2 = vmul.f32 0.5, %v2147_v0  ;;  %v1211_v4 = vpop.f32.mrb[64].mxu1  ;;  %1769 = vmatmul.mubr.msk.f32.gmra.mrb[54].mxu0 %vm711_vm4, %v1305_v63  ;;  %v1326_v58 = vsub.s32 0, %v1325_v57  ;;  %v1330_v60 = vsub.s32 1, %v1325_v57 }
 0x317   : > { %2152 = vtanh.f32 %v1252_v1  ;;  %v1212_v5 = vadd.f32 %v2694_v47, %v1211_v4  ;;  %v1939_v6 = vpop.f32.mrb[65].mxu1  ;;  %1515 = vmatprep.mubr.f32.mxu0 %v2231_v38 }
 0x318   : > { %v1306_v7 = vadd.f32 0.5, %v1287_v2  ;;  %v2757_v61 = vrot.slane %v1322_v59, %v1326_v58  ;;  %v2759_v62 = vrot.slane %v1322_v59, %v1330_v60 }
 0x319   : > { %v2149_v8 = vpop.eup %2148  ;;  %v1253_v9 = vmul.f32 0.5, %v1212_v5 }
 0x31a   : > { %v1288_v10 = vmul.f32 0.5, %v2149_v8  ;;  %v1216_v11 = vpop.f32.mrb[66].mxu1  ;;  %1770 = vmatmul.mubr.msk.f32.gmra.mrb[56].mxu0 %vm711_vm4, %v1306_v7 }
 0x31b   : > { %2154 = vtanh.f32 %v1253_v9  ;;  %v1217_v12 = vadd.f32 %v2694_v47, %v1216_v11  ;;  %v1942_v13 = vpop.f32.mrb[67].mxu1  ;;  %1521 = vmatprep.mubr.f32.mxu0 %v2231_v38 }
 0x31c   : > { %v1307_v14 = vadd.f32 0.5, %v1288_v10 }
 0x31d   : > { %v2151_v15 = vpop.eup %2150  ;;  %v1254_v16 = vmul.f32 0.5, %v1217_v12 }
 0x31e   : > { %v1289_v17 = vmul.f32 0.5, %v2151_v15  ;;  %v1221_v19 = vpop.f32.mrb[68].mxu1  ;;  %1771 = vmatmul.mubr.msk.f32.gmra.mrb[58].mxu0 %vm711_vm4, %v1307_v14 }
 0x31f   : > { %2156 = vtanh.f32 %v1254_v16  ;;  %v1222_v20 = vadd.f32 %v2694_v47, %v1221_v19  ;;  %v1945_v21 = vpop.f32.mrb[69].mxu1  ;;  %1527 = vmatprep.mubr.f32.mxu0 %v2231_v38 }
 0x320   : > { %v1308_v22 = vadd.f32 0.5, %v1289_v17 }
 0x321   : > { %v2153_v23 = vpop.eup %2152  ;;  %v1255_v18 = vmul.f32 0.5, %v1222_v20 }
 0x322   : > { %v1290_v24 = vmul.f32 0.5, %v2153_v23  ;;  %v1226_v25 = vpop.f32.mrb[70].mxu1  ;;  %1772 = vmatmul.mubr.msk.f32.gmra.mrb[60].mxu0 %vm711_vm4, %v1308_v22 }
 0x323   : > { %2158 = vtanh.f32 %v1255_v18  ;;  %v1227_v26 = vadd.f32 %v2694_v47, %v1226_v25  ;;  %v1948_v27 = vpop.f32.mrb[71].mxu1  ;;  %1533 = vmatprep.mubr.f32.mxu0 %v2231_v38 }
 0x324   : > { %v1309_v3 = vadd.f32 0.5, %v1290_v24 }
 0x325   : > { %v2155_v28 = vpop.eup %2154  ;;  %v1256_v29 = vmul.f32 0.5, %v1227_v26 }
 0x326   : > { %v1291_v30 = vmul.f32 0.5, %v2155_v28  ;;  %v1231_v31 = vpop.f32.mrb[72].mxu1  ;;  %1773 = vmatmul.mubr.msk.f32.gmra.mrb[62].mxu0 %vm711_vm4, %v1309_v3 }
 0x327   : > { %2160 = vtanh.f32 %v1256_v29  ;;  %v1232_v32 = vadd.f32 %v2694_v47, %v1231_v31  ;;  %v1951_v33 = vpop.f32.mrb[73].mxu1  ;;  %1539 = vmatprep.mubr.f32.mxu0 %v2231_v38 }
 0x328   : > { %v1310_v34 = vadd.f32 0.5, %v1291_v30 }
 0x329   : > { %v2157_v36 = vpop.eup %2156  ;;  %v1257_v37 = vmul.f32 0.5, %v1232_v32 }
 0x32a   : > { %v1292_v35 = vmul.f32 0.5, %v2157_v36  ;;  %v1236_v39 = vpop.f32.mrb[74].mxu1  ;;  %1774 = vmatmul.mubr.msk.f32.gmra.mrb[64].mxu0 %vm711_vm4, %v1310_v34 }
 0x32b   : > { %2162 = vtanh.f32 %v1257_v37  ;;  %v1237_v40 = vadd.f32 %v2694_v47, %v1236_v39  ;;  %v1954_v41 = vpop.f32.mrb[75].mxu1 }
 0x32c   : > { %v1311_v42 = vadd.f32 0.5, %v1292_v35 }
 0x32d   : > { %v2159_v43 = vpop.eup %2158  ;;  %v1258_v44 = vmul.f32 0.5, %v1237_v40 }
 0x32e   : > { %v1293_v45 = vmul.f32 0.5, %v2159_v43  ;;  %1775 = vmatmul.mubr.msk.f32.vlgmr.msra.gmra.mrb[76].mxu1 %vm711_vm4, %v1311_v42 }
 0x32f   : > { %2164 = vtanh.f32 %v1258_v44  ;;  %1551 = vmatprep.mubr.f32.mxu1 %v2231_v38 }
 0x330   : > { %v1312_v46 = vadd.f32 0.5, %v1293_v45 }
 0x331   : > { %v2161_v48 = vpop.eup %2160 }
 0x332   : > { %v1294_v49 = vmul.f32 0.5, %v2161_v48  ;;  %1776 = vmatmul.mubr.msk.f32.gmra.mrb[78].mxu1 %vm711_vm4, %v1312_v46 }
 0x333   : > { %1557 = vmatprep.mubr.f32.mxu1 %v2231_v38 }
 0x334   : > { %v1313_v50 = vadd.f32 0.5, %v1294_v49 }
 0x335   : > { %v2163_v47 = vpop.eup %2162 }
 0x336   : > { %v1295_v51 = vmul.f32 0.5, %v2163_v47  ;;  %1777 = vmatmul.mubr.msk.f32.gmra.mrb[80].mxu1 %vm711_vm4, %v1313_v50 }
 0x337   : > { %1563 = vmatprep.mubr.f32.mxu1 %v2231_v38 }
 0x338   : > { %v1314_v52 = vadd.f32 0.5, %v1295_v51 }
 0x339   : > { %v2165_v53 = vpop.eup %2164 }
 0x33a   : > { %v1296_v54 = vmul.f32 0.5, %v2165_v53  ;;  %1778 = vmatmul.mubr.msk.f32.gmra.mrb[82].mxu1 %vm711_vm4, %v1314_v52 }
 0x33b   : > { %1569 = vmatprep.mubr.f32.mxu1 %v2231_v38 }
 0x33c   : > { %v1315_v55 = vadd.f32 0.5, %v1296_v54 }
 0x33e   : > { %1779 = vmatmul.mubr.msk.f32.gmra.mrb[84].mxu1 %vm711_vm4, %v1315_v55 }
 0x3c9   : > { %v1463_v63 = vpop.f32.mrb[38].mxu0 }
 0x3ca   : > { %v1464_v38 = vadd.f32 %v1463_v63, %v2757_v61  ;;  %v1465_v0 = vpop.f32.mrb[39].mxu0 }
 0x3cb   : > { %v1466_v1 = vadd.f32 %v1465_v0, %v2759_v62 }
 0x3cc   : > { %1576 = vst [vmem:[%s2763_s28] sm:$0xff] %v1464_v38 }
 0x3cd   : > { %1577 = vst [vmem:[%s2763_s28 + $0x8] sm:$0xff] %v1466_v1  ;;  %v1469_v2 = vpop.f32.mrb[40].mxu0 }
 0x3ce   : > { %v1470_v4 = vadd.f32 %v1469_v2, %v2757_v61  ;;  %v1471_v5 = vpop.f32.mrb[41].mxu0 }
 0x3cf   : > { %v1472_v6 = vadd.f32 %v1471_v5, %v2759_v62 }
 0x3d0   : > { %1578 = vst [vmem:[%s2763_s28 + $0x10] sm:$0xff] %v1470_v4 }
 0x3d1   : > { %1579 = vst [vmem:[%s2763_s28 + $0x18] sm:$0xff] %v1472_v6  ;;  %v1475_v7 = vpop.f32.mrb[42].mxu0 }
 0x3d2   : > { %v1476_v8 = vadd.f32 %v1475_v7, %v2757_v61  ;;  %v1477_v9 = vpop.f32.mrb[43].mxu0 }
 0x3d3   : > { %v1478_v10 = vadd.f32 %v1477_v9, %v2759_v62 }
 0x3d4   : > { %1580 = vst [vmem:[%s2763_s28 + $0x20] sm:$0xff] %v1476_v8 }
 0x3d5   : > { %1581 = vst [vmem:[%s2763_s28 + $0x28] sm:$0xff] %v1478_v10  ;;  %v1481_v11 = vpop.f32.mrb[44].mxu0 }
 0x3d6   : > { %v1482_v12 = vadd.f32 %v1481_v11, %v2757_v61  ;;  %v1483_v13 = vpop.f32.mrb[45].mxu0 }
 0x3d7   : > { %v1484_v14 = vadd.f32 %v1483_v13, %v2759_v62 }
 0x3d8   : > { %1582 = vst [vmem:[%s2763_s28 + $0x30] sm:$0xff] %v1482_v12 }
 0x3d9   : > { %1583 = vst [vmem:[%s2763_s28 + $0x38] sm:$0xff] %v1484_v14  ;;  %v1487_v15 = vpop.f32.mrb[46].mxu0 }
 0x3da   : > { %v1488_v16 = vadd.f32 %v1487_v15, %v2757_v61  ;;  %v1489_v17 = vpop.f32.mrb[47].mxu0 }
 0x3db   : > { %v1490_v19 = vadd.f32 %v1489_v17, %v2759_v62 }
 0x3dc   : > { %1584 = vst [vmem:[%s2763_s28 + $0x40] sm:$0xff] %v1488_v16 }
 0x3dd   : > { %1585 = vst [vmem:[%s2763_s28 + $0x48] sm:$0xff] %v1490_v19  ;;  %v1493_v20 = vpop.f32.mrb[48].mxu0 }
 0x3de   : > { %v1494_v21 = vadd.f32 %v1493_v20, %v2757_v61  ;;  %v1495_v22 = vpop.f32.mrb[49].mxu0 }
 0x3df   : > { %v1496_v23 = vadd.f32 %v1495_v22, %v2759_v62 }
 0x3e0   : > { %1586 = vst [vmem:[%s2763_s28 + $0x50] sm:$0xff] %v1494_v21 }
 0x3e1   : > { %1587 = vst [vmem:[%s2763_s28 + $0x58] sm:$0xff] %v1496_v23  ;;  %v1499_v18 = vpop.f32.mrb[50].mxu0 }
 0x3e2   : > { %v1500_v24 = vadd.f32 %v1499_v18, %v2757_v61  ;;  %v1501_v25 = vpop.f32.mrb[51].mxu0 }
 0x3e3   : > { %v1502_v26 = vadd.f32 %v1501_v25, %v2759_v62 }
 0x3e4   : > { %1588 = vst [vmem:[%s2763_s28 + $0x60] sm:$0xff] %v1500_v24 }
 0x3e5   : > { %1589 = vst [vmem:[%s2763_s28 + $0x68] sm:$0xff] %v1502_v26  ;;  %v1505_v27 = vpop.f32.mrb[52].mxu0 }
 0x3e6   : > { %v1506_v3 = vadd.f32 %v1505_v27, %v2757_v61  ;;  %v1507_v28 = vpop.f32.mrb[53].mxu0 }
 0x3e7   : > { %v1508_v29 = vadd.f32 %v1507_v28, %v2759_v62 }
 0x3e8   : > { %1590 = vst [vmem:[%s2763_s28 + $0x70] sm:$0xff] %v1506_v3 }
 0x3e9   : > { %1591 = vst [vmem:[%s2763_s28 + $0x78] sm:$0xff] %v1508_v29  ;;  %v1511_v30 = vpop.f32.mrb[54].mxu0 }
 0x3ea   : > { %v1512_v31 = vadd.f32 %v1511_v30, %v2757_v61  ;;  %v1513_v32 = vpop.f32.mrb[55].mxu0 }
 0x3eb   : > { %v1514_v33 = vadd.f32 %v1513_v32, %v2759_v62 }
 0x3ec   : > { %1592 = vst [vmem:[%s2763_s28 + $0x80] sm:$0xff] %v1512_v31 }
 0x3ed   : > { %1593 = vst [vmem:[%s2763_s28 + $0x88] sm:$0xff] %v1514_v33  ;;  %v1517_v34 = vpop.f32.mrb[56].mxu0 }
 0x3ee   : > { %v1518_v36 = vadd.f32 %v1517_v34, %v2757_v61  ;;  %v1519_v37 = vpop.f32.mrb[57].mxu0 }
 0x3ef   : > { %v1520_v35 = vadd.f32 %v1519_v37, %v2759_v62 }
 0x3f0   : > { %1594 = vst [vmem:[%s2763_s28 + $0x90] sm:$0xff] %v1518_v36 }
 0x3f1   : > { %1595 = vst [vmem:[%s2763_s28 + $0x98] sm:$0xff] %v1520_v35  ;;  %v1523_v39 = vpop.f32.mrb[58].mxu0 }
 0x3f2   : > { %v1524_v40 = vadd.f32 %v1523_v39, %v2757_v61  ;;  %v1525_v41 = vpop.f32.mrb[59].mxu0 }
 0x3f3   : > { %v1526_v42 = vadd.f32 %v1525_v41, %v2759_v62 }
 0x3f4   : > { %1596 = vst [vmem:[%s2763_s28 + $0xa0] sm:$0xff] %v1524_v40 }
 0x3f5   : > { %1597 = vst [vmem:[%s2763_s28 + $0xa8] sm:$0xff] %v1526_v42  ;;  %v1529_v43 = vpop.f32.mrb[60].mxu0 }
 0x3f6   : > { %v1530_v44 = vadd.f32 %v1529_v43, %v2757_v61  ;;  %v1531_v45 = vpop.f32.mrb[61].mxu0 }
 0x3f7   : > { %v1532_v46 = vadd.f32 %v1531_v45, %v2759_v62 }
 0x3f8   : > { %1598 = vst [vmem:[%s2763_s28 + $0xb0] sm:$0xff] %v1530_v44 }
 0x3f9   : > { %1599 = vst [vmem:[%s2763_s28 + $0xb8] sm:$0xff] %v1532_v46  ;;  %v1535_v48 = vpop.f32.mrb[62].mxu0 }
 0x3fa   : > { %v1536_v49 = vadd.f32 %v1535_v48, %v2757_v61  ;;  %v1537_v50 = vpop.f32.mrb[63].mxu0 }
 0x3fb   : > { %v1538_v47 = vadd.f32 %v1537_v50, %v2759_v62 }
 0x3fc   : > { %1600 = vst [vmem:[%s2763_s28 + $0xc0] sm:$0xff] %v1536_v49 }
 0x3fd   : > { %1601 = vst [vmem:[%s2763_s28 + $0xc8] sm:$0xff] %v1538_v47  ;;  %v1541_v51 = vpop.f32.mrb[64].mxu0 }
 0x3fe   : > { %v1542_v52 = vadd.f32 %v1541_v51, %v2757_v61  ;;  %v1543_v53 = vpop.f32.mrb[65].mxu0 }
 0x3ff   : > { %v1544_v54 = vadd.f32 %v1543_v53, %v2759_v62 }
 0x400   : > { %1602 = vst [vmem:[%s2763_s28 + $0xd0] sm:$0xff] %v1542_v52 }
 0x401   : > { %1603 = vst [vmem:[%s2763_s28 + $0xd8] sm:$0xff] %v1544_v54  ;;  %v1547_v55 = vpop.f32.mrb[76].mxu1 }
 0x402   : > { %v1548_v56 = vadd.f32 %v1547_v55, %v2757_v61  ;;  %v1549_v57 = vpop.f32.mrb[77].mxu1 }
 0x403   : > { %v1550_v58 = vadd.f32 %v1549_v57, %v2759_v62 }
 0x404   : > { %1604 = vst [vmem:[%s2763_s28 + $0xe0] sm:$0xff] %v1548_v56 }
 0x405   : > { %1605 = vst [vmem:[%s2763_s28 + $0xe8] sm:$0xff] %v1550_v58  ;;  %v1553_v59 = vpop.f32.mrb[78].mxu1 }
 0x406   : > { %v1554_v60 = vadd.f32 %v1553_v59, %v2757_v61  ;;  %v1555_v63 = vpop.f32.mrb[79].mxu1 }
 0x407   : > { %v1556_v38 = vadd.f32 %v1555_v63, %v2759_v62 }
 0x408   : > { %1606 = vst [vmem:[%s2763_s28 + $0xf0] sm:$0xff] %v1554_v60 }
 0x409   : > { %1607 = vst [vmem:[%s2763_s28 + $0xf8] sm:$0xff] %v1556_v38  ;;  %v1559_v0 = vpop.f32.mrb[80].mxu1 }
 0x40a   : > { %v1560_v1 = vadd.f32 %v1559_v0, %v2757_v61  ;;  %v1561_v2 = vpop.f32.mrb[81].mxu1 }
 0x40b   : > { %v1562_v4 = vadd.f32 %v1561_v2, %v2759_v62 }
 0x40c   : > { %1608 = vst [vmem:[%s2763_s28 + $0x100] sm:$0xff] %v1560_v1 }
 0x40d   : > { %1609 = vst [vmem:[%s2763_s28 + $0x108] sm:$0xff] %v1562_v4  ;;  %v1565_v5 = vpop.f32.mrb[82].mxu1 }
 0x40e   : > { %v1566_v6 = vadd.f32 %v1565_v5, %v2757_v61  ;;  %v1567_v7 = vpop.f32.mrb[83].mxu1 }
 0x40f   : > { %v1568_v8 = vadd.f32 %v1567_v7, %v2759_v62 }
 0x410   : > { %1610 = vst [vmem:[%s2763_s28 + $0x110] sm:$0xff] %v1566_v6 }
 0x411   : > { %1611 = vst [vmem:[%s2763_s28 + $0x118] sm:$0xff] %v1568_v8  ;;  %v1571_v9 = vpop.f32.mrb[84].mxu1 }
 0x412   : > { %v1572_v10 = vadd.f32 %v1571_v9, %v2757_v61  ;;  %v1573_v11 = vpop.f32.mrb[85].mxu1 }
 0x413   : > { %v1574_v12 = vadd.f32 %v1573_v11, %v2759_v62 }
 0x414   : > { %1612 = vst [vmem:[%s2763_s28 + $0x120] sm:$0xff] %v1572_v10 }
 0x415   : > { %1613 = vst [vmem:[%s2763_s28 + $0x128] sm:$0xff] %v1574_v12 }
 0x416   : > { %2179 = shalt.err (!%p2176_p3)
}
 0x417   : > { %s2180_s23 = scalar_lea.hbm %s2841_s17, 4864  ;;  %s2184_s29 = scalar_lea.hbm %s2900_s9, 9728 }
 0x418   : > { %p2181_p4 = scmp.ne.s32.totalorder %s2841_s17, %s2180_s23  ;;  %p2185_p9 = scmp.lt.u32.totalorder %s2841_s17, %s2900_s9 }
 0x419   : > { %p2186_p10 = scmp.lt.u32.totalorder %s2184_s29, %s2180_s23  ;;  %p2188_p12 = scmp.lt.u32.totalorder %s2180_s23, %s2841_s17 }
 0x41a   : > { %p2182_p7 = pnand %p2181_p4, %p2325_p5 }
 0x41b   : > { %p2187_p11 = por %p2186_p10, %p2185_p9 }
 0x41c   : > { %p2183_p8 = pneg %p2182_p7 }
 0x41d   : > { %p2189_p13 = por %p2188_p12, %p2187_p11 }
 0x41f   : > { %p2190_p0 = pnand %p2189_p13, %p2183_p8 }
 0x421   : > { %2193 = shalt.err (!%p2190_p0)
}
 0x422   : > { %s2235_s21 = smov 256   ;;  %s2236_s22 = smov 16  }
 0x423   : > { %2007 = dma.vmem_to_hbm [thread:$0]  (%p2325_p5), %s2843_s14, 4864, %s2841_s17, %s2850_s13, %s2235_s21, %s2235_s21, %s2236_s22  }
 0x424 PF: > { %p2013_p1 = scmp.ge.s32.totalorder %s2228_s12, 2  ;;  %s1644_s24 = sand.u32 1, %s2216_s30  }
 0x425   : > { %s1645_s25 = scalar_lea.sflag [#allocation3], %s1644_s24 }
 0x426   : > { %p2010_p2 = pnand %p2013_p1, %p2329_p6 }
 0x428   : > { %2211 = dma.done.wait (!%p2010_p2), %s1645_s25, 4864  }
 0x429   : > { %2213 = vsyncadd (!%p2010_p2), %s1645_s25, 4294962432  ;;  %p19_p3 = scmp.ge.s32.totalorder %s2312_s15, 4   ;;  %s2903_s30 = smov %s2220_s10 }
 0x42a   : > { %s2904_s10 = smov %s2224_s11  ;;  %s2905_s11 = smov %s2323_s18 }
 0x42b   : > { %s2906_s12 = smov %s2312_s15  ;;  %21 = sbr.rel (!%p19_p3) target bundleno = 3 (0x3), region = 91 }
 0x432   :  { %1650 = vsyncpa [#allocation3], 1 }
 0x433   :  { %1652 = vsyncpa [#allocation3 + $0x1], 1 }

</bundles_post_ra>
